<compile_context>
chip_gen: v7x
topology: tpu7x:2x2x1
jax: 0.10.0
libtpu: 0.0.40
codegen_flags: <defaults>
</compile_context>

<pallas_src>
import functools
import math

import jax
import jax.numpy as jnp
import numpy as np
from jax.experimental import pallas as pl
from jax.experimental.pallas import tpu as pltpu

_TWO_PI = 2.0 * math.pi


def _round_up(x: int, m: int) -> int:
    return ((x + m - 1) // m) * m


def _linear_upsample_matrix(n_frames: int, n_samples: int) -> np.ndarray:
    """(n_frames, n_samples) endpoint-aligned linear interpolation weights (float64)."""
    # TODO(synk): DDSP's HarmonicOscillator uses overlapping-window ('window')
    # resampling for amplitude envelopes; linear interpolation is used here instead.
    pos = np.arange(n_samples, dtype=np.float64) * (n_frames - 1) / max(n_samples - 1, 1)
    i0 = np.clip(np.floor(pos).astype(np.int64), 0, max(n_frames - 2, 0))
    frac = pos - i0
    w = np.zeros((n_frames, n_samples), dtype=np.float64)
    cols = np.arange(n_samples)
    w[i0, cols] += 1.0 - frac
    if n_frames > 1:
        w[i0 + 1, cols] += frac
    return w


@functools.lru_cache(maxsize=16)
def _interp_matrices(n_frames: int, n_samples: int, t_pad: int, n_pad: int):
    """Cached (t_pad, n_pad) interp weights W and their column-cumsum Wc (f32)."""
    # TODO(synk): W has only 2 nonzeros per column; for very large n_samples it
    # could be synthesized in-kernel from broadcasted_iota instead of streamed.
    w64 = np.zeros((t_pad, n_pad), dtype=np.float64)
    w64[:n_frames, :n_samples] = _linear_upsample_matrix(n_frames, n_samples)
    wc64 = np.cumsum(w64, axis=1)          # cumulative weights -> fused phase cumsum
    return (np.asarray(w64, dtype=np.float32), np.asarray(wc64, dtype=np.float32))


def _frame_controls(amplitudes, harmonic_distribution, harmonic_shifts, f0_hz):
    """Frame-level harmonic controls as 2-D row stacks.

    Returns:
      freq_rows: (S*B*h_pad, T)  harmonic frequencies in Hz; row = (s, b, k).
      amp_rows:  (B*h_pad, T)    harmonic amplitudes (shared across substrings).
      h_pad:     harmonics padded up to a multiple of 8 (sublane alignment).
    """
    amplitudes = amplitudes.astype(jnp.float32)
    harmonic_distribution = harmonic_distribution.astype(jnp.float32)
    harmonic_shifts = harmonic_shifts.astype(jnp.float32)
    f0_hz = f0_hz.astype(jnp.float32)

    b, t, h = harmonic_distribution.shape
    s = f0_hz.shape[-1]
    h_pad = _round_up(h, 8)

    ratios = jnp.arange(1, h + 1, dtype=jnp.float32)                     # (H,)
    f0 = jnp.transpose(f0_hz, (0, 2, 1))[..., None]                      # (B,S,T,1)
    # harmonic frequencies = f0 * k * (1 + shift_k)
    freq_frames = f0 * ratios * (1.0 + harmonic_shifts[:, None])         # (B,S,T,H)
    amp_frames = amplitudes * harmonic_distribution                      # (B,T,H)

    freq_rows = jnp.transpose(freq_frames, (1, 0, 3, 2))                 # (S,B,H,T)
    amp_rows = jnp.transpose(amp_frames, (0, 2, 1))                      # (B,H,T)
    if h_pad > h:
        freq_rows = jnp.pad(freq_rows, ((0, 0), (0, 0), (0, h_pad - h), (0, 0)))
        amp_rows = jnp.pad(amp_rows, ((0, 0), (0, h_pad - h), (0, 0)))
    freq_rows = freq_rows.reshape(s * b * h_pad, t)
    amp_rows = amp_rows.reshape(b * h_pad, t)
    return freq_rows, amp_rows, h_pad


def _pick_sample_tile(n_samples, rows_f, rows_a, t_pad, batch,
                      budget_bytes=20 * 1024 * 1024, max_tile=8192):
    """Largest 128-multiple sample tile whose VMEM footprint fits the budget."""
    # Live f32 temporaries (freq/phase/masked-sin over rows_f; amp/acc/product
    # over rows_a) + double-buffered W/Wc input blocks + double-buffered output.
    per_lane_bytes = 4 * (4 * rows_f + 3 * rows_a + 4 * t_pad + 2 * batch)
    fit = max(128, (budget_bytes // per_lane_bytes) // 128 * 128)
    return int(min(max_tile, _round_up(n_samples, 128), fit))


def _multi_inharm_kernel(freq_ref, amp_ref, w_ref, wc_ref, out_ref, *,
                         n_sub, batch, h_pad, sample_rate, sin_dtype):
    """One sample-tile: fused upsample + cumsum + osc bank + substring/harmonic sum."""
    f = freq_ref[...]                     # (S*B*h_pad, Tp) frame-level harmonic freqs
    a = amp_ref[...]                      # (B*h_pad, Tp)   frame-level harmonic amps
    w = w_ref[...]                        # (Tp, tn)        frame->sample interp weights
    wc = wc_ref[...]                      # (Tp, tn)        cumulative interp weights

    # freq only feeds the Nyquist mask and amp tolerance is loose: default
    # (single-pass) MXU precision.  Phase needs full accuracy (it grows with the
    # sample index before wrapping): HIGHEST.
    freq = jnp.dot(f, w, preferred_element_type=jnp.float32)             # (S*B*h_pad, tn)
    amp = jnp.dot(a, w, preferred_element_type=jnp.float32)              # (B*h_pad, tn)
    phase = jnp.dot(f, wc, precision=jax.lax.Precision.HIGHEST,
                    preferred_element_type=jnp.float32)                  # (S*B*h_pad, tn)
    phase = phase * jnp.float32(_TWO_PI / sample_rate)
    # Wrap phase to [0, 2*pi) before sin (numerical safety for long signals).
    phase = phase - jnp.float32(_TWO_PI) * jnp.floor(phase * jnp.float32(1.0 / _TWO_PI))

    # remove_above_nyquist: zero the phase where masked (sin(0)=0), so freq dies
    # here and fewer full-size temporaries stay live through the sin.
    nyquist = jnp.float32(sample_rate / 2.0)
    phase = jnp.where(freq < nyquist, phase, jnp.float32(0.0))

    # TODO(synk): on v6e/v7x pass sin_dtype=jnp.bfloat16 for ~2x VPU throughput on
    # the sin polynomial (the binding slot); kept f32 by default for accuracy and
    # because v5e has no bf16 VPU/EUP.
    if sin_dtype == jnp.float32:
        msin = jnp.sin(phase)                                            # (S*B*h_pad, tn)
    else:
        msin = jnp.sin(phase.astype(sin_dtype)).astype(jnp.float32)

    # Substring reduction first (amps are shared across substrings): rows are
    # laid out (s, b, k) so each substring is a contiguous (B*h_pad)-row slab.
    rows_b = batch * h_pad
    acc = msin[0:rows_b]
    for s in range(1, n_sub):
        acc = acc + msin[s * rows_b:(s + 1) * rows_b]                    # (B*h_pad, tn)

    # Apply harmonic amplitudes once, reduce over harmonics per batch row.
    audio = (amp * acc).reshape(batch, h_pad, acc.shape[-1]).sum(axis=1)  # (B, tn)
    out_ref[...] = audio


def multi_inharmonic_forward(amplitudes, harmonic_distribution, harmonic_shifts,
                             f0_hz, *, n_samples=128, sample_rate=16000,
                             sin_dtype=jnp.float32,
                             vmem_budget_bytes=20 * 1024 * 1024):
    """MultiInharmonic.forward: summed per-substring inharmonic audio (B, n_samples)."""
    freq_rows, amp_rows, h_pad = _frame_controls(
        amplitudes, harmonic_distribution, harmonic_shifts, f0_hz)
    b = amplitudes.shape[0]
    s = f0_hz.shape[-1]
    rows_f, t = freq_rows.shape
    rows_a = amp_rows.shape[0]
    sin_dtype = jnp.dtype(sin_dtype)

    # Frame (contraction) dim only needs sublane (x8) alignment, not x128.
    t_pad = _round_up(t, 8)
    tile_n = _pick_sample_tile(n_samples, rows_f, rows_a, t_pad, b, vmem_budget_bytes)
    n_pad = _round_up(n_samples, tile_n)

    w_np, wc_np = _interp_matrices(t, n_samples, t_pad, n_pad)
    w = jnp.asarray(w_np)
    wc = jnp.asarray(wc_np)

    if t_pad > t:
        freq_rows = jnp.pad(freq_rows, ((0, 0), (0, t_pad - t)))
        amp_rows = jnp.pad(amp_rows, ((0, 0), (0, t_pad - t)))

    kernel = functools.partial(
        _multi_inharm_kernel, n_sub=s, batch=b, h_pad=h_pad,
        sample_rate=float(sample_rate), sin_dtype=sin_dtype)

    out = pl.pallas_call(
        kernel,
        out_shape=jax.ShapeDtypeStruct((b, n_pad), jnp.float32),
        grid_spec=pltpu.PrefetchScalarGridSpec(
            num_scalar_prefetch=0,
            grid=(n_pad // tile_n,),
            in_specs=[
                # Frame-level controls: constant block index -> DMA'd once.
                pl.BlockSpec((rows_f, t_pad), lambda ni: (0, 0)),   # freq rows
                pl.BlockSpec((rows_a, t_pad), lambda ni: (0, 0)),   # amp rows
                # W / Wc sample tiles: streamed exactly once each (no per-batch axis).
                pl.BlockSpec((t_pad, tile_n), lambda ni: (0, ni)),  # W tile
                pl.BlockSpec((t_pad, tile_n), lambda ni: (0, ni)),  # Wc tile
            ],
            out_specs=pl.BlockSpec((b, tile_n), lambda ni: (0, ni)),
        ),
        compiler_params=pltpu.CompilerParams(
            # Wc carries the full cumsum from sample 0, so sample tiles are
            # independent -> single parallel axis (megacore / v7x can shard it).
            dimension_semantics=("parallel",),
            # Above the 16/32 MiB scoped defaults, comfortably below v7x's 64 MiB.
            vmem_limit_bytes=40 * 1024 * 1024),
    )(freq_rows, amp_rows, w, wc)
    return out[:, :n_samples]


def _reference_forward(amplitudes, harmonic_distribution, harmonic_shifts,
                       f0_hz, *, n_samples=128, sample_rate=16000):
    """Pure-JAX reference with identical semantics (sequential per-sample cumsum)."""
    amplitudes = amplitudes.astype(jnp.float32)
    harmonic_distribution = harmonic_distribution.astype(jnp.float32)
    harmonic_shifts = harmonic_shifts.astype(jnp.float32)
    f0_hz = f0_hz.astype(jnp.float32)

    b, t, h = harmonic_distribution.shape
    ratios = jnp.arange(1, h + 1, dtype=jnp.float32)
    f0 = jnp.transpose(f0_hz, (0, 2, 1))[..., None]                        # (B,S,T,1)
    freq_frames = f0 * ratios * (1.0 + harmonic_shifts[:, None])           # (B,S,T,H)
    amp_frames = amplitudes * harmonic_distribution                        # (B,T,H)

    w = jnp.asarray(_linear_upsample_matrix(t, n_samples), dtype=jnp.float32)
    freq_env = jnp.einsum("bsth,tn->bshn", freq_frames, w, precision="highest")
    amp_env = jnp.einsum("bth,tn->bhn", amp_frames, w, precision="highest")

    nyquist = sample_rate / 2.0
    amp = jnp.where(freq_env >= nyquist, 0.0, amp_env[:, None, :, :])      # (B,S,H,N)
    phase = jnp.cumsum(freq_env * (2.0 * math.pi / sample_rate), axis=-1)
    return jnp.sum(amp * jnp.sin(phase), axis=(1, 2))                      # (B, N)


if __name__ == "__main__":
    key = jax.random.PRNGKey(0)
    B, T, H, S = 2, 8, 16, 3          # batch, frames, harmonics, substrings
    N_SAMPLES, SR = 128, 16000

    k1, k2, k3, k4 = jax.random.split(key, 4)
    amplitudes = jax.random.uniform(k1, (B, T, 1), jnp.float32, 0.1, 1.0)
    harmonic_distribution = jax.random.uniform(k2, (B, T, H), jnp.float32, 0.0, 1.0)
    harmonic_distribution = harmonic_distribution / jnp.sum(
        harmonic_distribution, axis=-1, keepdims=True)
    harmonic_shifts = jax.random.uniform(k3, (B, T, H), jnp.float32, 0.0, 0.01)
    f0_hz = jax.random.uniform(k4, (B, T, S), jnp.float32, 100.0, 450.0)

    audio = multi_inharmonic_forward(
        amplitudes, harmonic_distribution, harmonic_shifts, f0_hz,
        n_samples=N_SAMPLES, sample_rate=SR)
    audio = jax.block_until_ready(audio)

    ref = _reference_forward(
        amplitudes, harmonic_distribution, harmonic_shifts, f0_hz,
        n_samples=N_SAMPLES, sample_rate=SR)
    np.testing.assert_allclose(np.asarray(audio), np.asarray(ref), rtol=1e-2, atol=1e-2)

    print("KERNEL_OK")
</pallas_src>

<mosaic_0001>
module attributes {stable_mosaic.version = 11 : i64} {
  func.func @_multi_inharm_kernel(%arg0: i32, %arg1: memref<96x8xf32, #tpu.memory_space<vmem>>, %arg2: memref<32x8xf32, #tpu.memory_space<vmem>>, %arg3: memref<8x128xf32, #tpu.memory_space<vmem>>, %arg4: memref<8x128xf32, #tpu.memory_space<vmem>>, %arg5: memref<2x128xf32, #tpu.memory_space<vmem>>) attributes {dimension_semantics = [#tpu.dimension_semantics<parallel>], iteration_bounds = array<i64: 1>, scalar_prefetch = 0 : i64, scratch_operands = 0 : i64, tpu.core_type = #tpu.core_type<tc>, window_params = [{pipeline_mode = #tpu.pipeline_mode<synchronous>, transform_indices = @transform_0, window_bounds = array<i64: 96, 8>}, {pipeline_mode = #tpu.pipeline_mode<synchronous>, transform_indices = @transform_1, window_bounds = array<i64: 32, 8>}, {transform_indices = @transform_2, window_bounds = array<i64: 8, 128>}, {transform_indices = @transform_3, window_bounds = array<i64: 8, 128>}, {transform_indices = @transform_4, window_bounds = array<i64: 2, 128>}]} {
    %c0 = arith.constant 0 : index
    %c0_0 = arith.constant 0 : index
    %0 = vector.load %arg1[%c0, %c0_0] : memref<96x8xf32, #tpu.memory_space<vmem>>, vector<96x8xf32>
    %c0_1 = arith.constant 0 : index
    %c0_2 = arith.constant 0 : index
    %1 = vector.load %arg2[%c0_1, %c0_2] : memref<32x8xf32, #tpu.memory_space<vmem>>, vector<32x8xf32>
    %c0_3 = arith.constant 0 : index
    %c0_4 = arith.constant 0 : index
    %2 = vector.load %arg3[%c0_3, %c0_4] : memref<8x128xf32, #tpu.memory_space<vmem>>, vector<8x128xf32>
    %c0_5 = arith.constant 0 : index
    %c0_6 = arith.constant 0 : index
    %3 = vector.load %arg4[%c0_5, %c0_6] : memref<8x128xf32, #tpu.memory_space<vmem>>, vector<8x128xf32>
    %cst = arith.constant dense<0.000000e+00> : vector<96x128xf32>
    %4 = tpu.matmul %0, %2, %cst {dimension_numbers = #tpu.dot_dimension_numbers<[1], [0], [0], [1], [0, 0, 1, 1], [], []>} : vector<96x8xf32>, vector<8x128xf32>, vector<96x128xf32> -> vector<96x128xf32>
    %cst_7 = arith.constant dense<0.000000e+00> : vector<32x128xf32>
    %5 = tpu.matmul %1, %2, %cst_7 {dimension_numbers = #tpu.dot_dimension_numbers<[1], [0], [0], [1], [0, 0, 1, 1], [], []>} : vector<32x8xf32>, vector<8x128xf32>, vector<32x128xf32> -> vector<32x128xf32>
    %cst_8 = arith.constant dense<0.000000e+00> : vector<96x128xf32>
    %6 = tpu.matmul %0, %3, %cst_8 {dimension_numbers = #tpu.dot_dimension_numbers<[1], [0], [0], [1], [0, 0, 1, 1], [], []>, precision = #tpu.contract_precision<fp32>} : vector<96x8xf32>, vector<8x128xf32>, vector<96x128xf32> -> vector<96x128xf32>
    %cst_9 = arith.constant 3.9269909E-4 : f32
    %7 = vector.broadcast %cst_9 : f32 to vector<96x128xf32>
    %8 = arith.mulf %6, %7 : vector<96x128xf32>
    %cst_10 = arith.constant 0.159154937 : f32
    %9 = vector.broadcast %cst_10 : f32 to vector<96x128xf32>
    %10 = arith.mulf %8, %9 : vector<96x128xf32>
    %11 = math.floor %10 : vector<96x128xf32>
    %cst_11 = arith.constant 6.28318548 : f32
    %12 = vector.broadcast %cst_11 : f32 to vector<96x128xf32>
    %13 = arith.mulf %12, %11 : vector<96x128xf32>
    %14 = arith.subf %8, %13 : vector<96x128xf32>
    %cst_12 = arith.constant 8.000000e+03 : f32
    %15 = vector.broadcast %cst_12 : f32 to vector<96x128xf32>
    %16 = arith.cmpf olt, %4, %15 : vector<96x128xf32>
    %cst_13 = arith.constant 0.000000e+00 : f32
    %17 = vector.broadcast %cst_13 : f32 to vector<96x128xf32>
    %18 = arith.select %16, %14, %17 : vector<96x128xi1>, vector<96x128xf32>
    %19 = math.sin %18 : vector<96x128xf32>
    %20 = vector.extract_strided_slice %19 {offsets = [0, 0], sizes = [32, 128], strides = [1, 1]} : vector<96x128xf32> to vector<32x128xf32>
    %21 = vector.extract_strided_slice %19 {offsets = [32, 0], sizes = [32, 128], strides = [1, 1]} : vector<96x128xf32> to vector<32x128xf32>
    %22 = arith.addf %20, %21 : vector<32x128xf32>
    %23 = vector.extract_strided_slice %19 {offsets = [64, 0], sizes = [32, 128], strides = [1, 1]} : vector<96x128xf32> to vector<32x128xf32>
    %24 = arith.addf %22, %23 : vector<32x128xf32>
    %25 = arith.mulf %5, %24 : vector<32x128xf32>
    %26 = vector.shape_cast %25 : vector<32x128xf32> to vector<2x16x128xf32>
    %cst_14 = arith.constant dense<0.000000e+00> : vector<2x128xf32>
    %27 = vector.multi_reduction <add>, %26, %cst_14 [1] : vector<2x16x128xf32> to vector<2x128xf32>
    %c0_15 = arith.constant 0 : index
    %c0_16 = arith.constant 0 : index
    %28 = vector.load %arg5[%c0_15, %c0_16] : memref<2x128xf32, #tpu.memory_space<vmem>>, vector<2x128xf32>
    tpu.vector_store %arg5[%c0_15, %c0_16], %27 {strides = array<i32>} : memref<2x128xf32, #tpu.memory_space<vmem>>, vector<2x128xf32>,
    return
  }
  func.func @transform_0(%arg0: i32) -> (i32, i32) {
    %c0_i32 = arith.constant 0 : i32
    %c0_i32_0 = arith.constant 0 : i32
    %c0_i32_1 = arith.constant 0 : i32
    return %c0_i32, %c0_i32_0 : i32, i32
  }
  func.func @transform_1(%arg0: i32) -> (i32, i32) {
    %c0_i32 = arith.constant 0 : i32
    %c0_i32_0 = arith.constant 0 : i32
    %c0_i32_1 = arith.constant 0 : i32
    return %c0_i32, %c0_i32_0 : i32, i32
  }
  func.func @transform_2(%arg0: i32) -> (i32, i32) {
    %c0_i32 = arith.constant 0 : i32
    %c0_i32_0 = arith.constant 0 : i32
    return %c0_i32, %arg0 : i32, i32
  }
  func.func @transform_3(%arg0: i32) -> (i32, i32) {
    %c0_i32 = arith.constant 0 : i32
    %c0_i32_0 = arith.constant 0 : i32
    return %c0_i32, %arg0 : i32, i32
  }
  func.func @transform_4(%arg0: i32) -> (i32, i32) {
    %c0_i32 = arith.constant 0 : i32
    %c0_i32_0 = arith.constant 0 : i32
    return %c0_i32, %arg0 : i32, i32
  }
}

</mosaic_0001>

<bundles_post_ra>
// kernel: tpu_custom_call.1
= control target key start
LH: loop header
LB: loop body
LE: loop exit
PB: predicated region body
PF: predicated region fallthrough
CT: control target
= control target key end

     0   :  { %vm36_vm0 = vcmask 64512   ;;  %s4569_s0 = inlined_call_operand.vmem [shape: f32[96,8], index: 0, kind: input, shape index: {}]   ;;  %s4570_s1 = inlined_call_operand.vmem [shape: f32[32,8], index: 1, kind: input, shape index: {}]   ;;  %s4571_s2 = inlined_call_operand.vmem [shape: f32[8,128], index: 2, kind: input, shape index: {}]   ;;  %s4572_s3 = inlined_call_operand.vmem [shape: f32[8,128], index: 3, kind: input, shape index: {}]   ;;  %s4573_s4 = inlined_call_operand.hbm [shape: f32[2,128], index: 4, kind: output, shape index: {}]  }
   0x1   :  { %v34_v0 = vld [vmem:[%s4571_s2] sm:$0xff]  ;;  %v19_v3 = vld [vmem:[%s4569_s0 + $0x8] sm:$0xff]  ;;  %v20_v8 = vld [vmem:[%s4569_s0 + $0x10] sm:$0xff] }
   0x2   :  { %v18_v1 = vld [vmem:[%s4569_s0] sm:$0xff]  ;;  %2752 = vmatprep.subr.mxu0 %v34_v0  ;;  %2772 = vmatprep.subr.mxu1 %v34_v0  ;;  %v31_v4 = vld [vmem:[%s4570_s1 + $0x8] sm:$0xff]  ;;  %v32_v11 = vld [vmem:[%s4570_s1 + $0x10] sm:$0xff]  ;;  %v41_v14 = vsel %vm36_vm0, %v19_v3, 0  ;;  %v44_v18 = vsel %vm36_vm0, %v20_v8, 0 }
   0x3   :  { %v30_v2 = vld [vmem:[%s4570_s1] sm:$0xff]  ;;  %2753 = vmatpush3.msra.mxu0 %v34_v0  ;;  %v38_v6 = vsel %vm36_vm0, %v18_v1, 0  ;;  %2754 = vmatprep.mubr.msk.f32.mxu0 %vm36_vm0, %v18_v1  ;;  %v3163_v12 = vld [vmem:[%s4569_s0 + $0x48] sm:$0xff]  ;;  %v21_v15 = vld [vmem:[%s4569_s0 + $0x18] sm:$0xff] }
   0x4   :  { %v35_v5 = vld [vmem:[%s4572_s3] sm:$0xff]  ;;  %2773 = vmatpush3.msra.mxu1 %v34_v0  ;;  %2774 = vmatprep.mubr.msk.f32.mxu1 %vm36_vm0, %v30_v2  ;;  %v3165_v13 = vand.u32 4294901760, %v38_v6  ;;  %v33_v16 = vld [vmem:[%s4570_s1 + $0x18] sm:$0xff]  ;;  %v3189_v21 = vld [vmem:[%s4569_s0 + $0x50] sm:$0xff] }
   0x5   :  { %v3141_v7 = vand.u32 4294901760, %v35_v5  ;;  %v3150_v9 = vld [vmem:[%s4569_s0 + $0x40] sm:$0xff]  ;;  %2755 = vmatmul.mubr.msk.f32.vlgmr.msra.gmra.mrb[0].mxu0 %vm36_vm0, %v19_v3  ;;  %2775 = vmatmul.mubr.msk.f32.vlgmr.msra.gmra.mrb[0].mxu1 %vm36_vm0, %v31_v4 }
   0x6   :  { %2757 = vmatprep.mubr.msk.f32.mxu0 %vm36_vm0, %v20_v8  ;;  %v62_v17 = vsel %vm36_vm0, %v3150_v9, 0  ;;  %v22_v19 = vld [vmem:[%s4569_s0 + $0x20] sm:$0xff] }
   0x7   :  { %v3155_v10 = vsub.f32 %v35_v5, %v3141_v7  ;;  %2780 = vmatprep.subr.mxu0 %v3141_v7  ;;  %v3184_v20 = vand.u32 4294901760, %v62_v17 }
   0x8   :  { %2781 = vmatpush3.msra.mxu0 %v3141_v7 }
   0x9   :  { %2900 = vmatprep.subr.mxu1 %v3155_v10 }
   0xa   :  { %9 = vsyncpa [#allocation3], 0  ;;  %2777 = vmatprep.mubr.msk.f32.mxu1 %vm36_vm0, %v32_v11  ;;  %2901 = vmatpush3.msra.mxu1 %v3155_v10  ;;  %v65_v22 = vsel %vm36_vm0, %v3163_v12, 0  ;;  %v3195_v23 = vand.u32 4294901760, %v41_v14  ;;  %v47_v24 = vsel %vm36_vm0, %v21_v15, 0  ;;  %v3201_v25 = vsub.f32 %v62_v17, %v3184_v20  ;;  %v29_v27 = vld [vmem:[%s4569_s0 + $0x58] sm:$0xff] }
   0xb   :  { %2758 = vmatmul.mubr.msk.f32.gmra.mrb[2].mxu0 %vm36_vm0, %v21_v15  ;;  %2778 = vmatmul.mubr.msk.f32.gmra.mrb[2].mxu1 %vm36_vm0, %v33_v16  ;;  %v3203_v26 = vand.u32 4294901760, %v65_v22  ;;  %v3209_v28 = vsub.f32 %v38_v6, %v3165_v13  ;;  %v3211_v29 = vand.u32 4294901760, %v44_v18  ;;  %v23_v30 = vld [vmem:[%s4569_s0 + $0x28] sm:$0xff]  ;;  %v68_v31 = vsel %vm36_vm0, %v3189_v21, 0  ;;  %v24_v34 = vld [vmem:[%s4569_s0 + $0x30] sm:$0xff]  ;;  %v25_v45 = vld [vmem:[%s4569_s0 + $0x38] sm:$0xff] }
   0xc   :  { %2760 = vmatprep.mubr.msk.f32.mxu0 %vm36_vm0, %v22_v19  ;;  %2840 = vmatprep.subr.mxu1 %v3141_v7  ;;  %v50_v32 = vsel %vm36_vm0, %v22_v19, 0  ;;  %v3228_v35 = vand.u32 4294901760, %v68_v31  ;;  %v3230_v36 = vand.u32 4294901760, %v47_v24  ;;  %v71_v37 = vsel %vm36_vm0, %v29_v27, 0  ;;  %s3095_s0 = smov [#allocation2]  }
   0xd   :  { %2834 = vmatprep.mubr.f32.mxu1 %v3201_v25  ;;  %v3223_v33 = vsub.f32 %v65_v22, %v3203_v26  ;;  %v484_v38 = vand.u32 4294901760, %v3155_v10  ;;  %v3235_v39 = vsub.f32 %v41_v14, %v3195_v23  ;;  %v53_v40 = vsel %vm36_vm0, %v23_v30, 0  ;;  %s2584_s22 = sshll.u32 %s3095_s0, 4  ;;  %s2585_s22 = int_to_ptr.vmem [resolvable:$true] %s2584_s22 }
   0xe   :  { %v3241_v41 = vsub.f32 %v68_v31, %v3228_v35  ;;  %v3243_v42 = vand.u32 4294901760, %v71_v37  ;;  %v3246_v43 = vsub.f32 %v44_v18, %v3211_v29  ;;  %v3248_v44 = vand.u32 4294901760, %v50_v32  ;;  %s3065_s23 = scalar_lea.vmem %s2585_s22, 32  ;;  %p3070_p1 = scmp.lt.s32.totalorder %s2585_s22, %s2585_s22 }
   0xf   :  { %2761 = vmatmul.mubr.msk.f32.gmra.mrb[4].mxu0 %vm36_vm0, %v23_v30  ;;  %2835 = vmatmul.mubr.f32.vlgmr.msra.gmra.mrb[4].mxu1 %v3223_v33  ;;  %v363_v46 = vand.u32 4294901760, %v3209_v28  ;;  %v485_v47 = vsub.f32 %v3155_v10, %v484_v38  ;;  %v56_v49 = vsel %vm36_vm0, %v24_v34, 0  ;;  %v373_v51 = vand.u32 4294901760, %v3235_v39  ;;  %p3066_p0 = scmp.ne.s32.totalorder %s2585_s22, %s3065_s23  ;;  %p3071_p2 = scmp.lt.s32.totalorder %s3065_s23, %s3065_s23 }
  0x10   :  { %2763 = vmatprep.mubr.msk.f32.mxu0 %vm36_vm0, %v24_v34  ;;  %2841 = vmatpush3.msra.mxu1 %v3141_v7  ;;  %v3259_v48 = vsub.f32 %v71_v37, %v3243_v42  ;;  %v3264_v52 = vsub.f32 %v47_v24, %v3230_v36  ;;  %v3266_v53 = vand.u32 4294901760, %v53_v40  ;;  %v3271_v54 = vsub.f32 %v50_v32, %v3248_v44 }
  0x11   :  { %2837 = vmatprep.mubr.f32.mxu1 %v3241_v41  ;;  %2860 = vmatprep.subr.mxu1 %v484_v38  ;;  %v486_v50 = vand.u32 4294901760, %v485_v47  ;;  %v59_v55 = vsel %vm36_vm0, %v25_v45, 0  ;;  %v383_v56 = vand.u32 4294901760, %v3246_v43  ;;  %v364_v57 = vsub.f32 %v3209_v28, %v363_v46  ;;  %p3072_p3 = por %p3071_p2, %p3070_p1 }
  0x12   :  { %v3278_v58 = vand.u32 4294901760, %v56_v49  ;;  %v374_v59 = vsub.f32 %v3235_v39, %v373_v51  ;;  %v3282_v60 = vsub.f32 %v53_v40, %v3266_v53  ;;  %v3284_v61 = vand.u32 4294901760, %v59_v55 }
  0x13   :  { %2764 = vmatmul.mubr.msk.f32.gmra.mrb[6].mxu0 %vm36_vm0, %v25_v45  ;;  %2838 = vmatmul.mubr.f32.gmra.mrb[6].mxu1 %v3259_v48  ;;  %v393_v62 = vand.u32 4294901760, %v3264_v52  ;;  %v365_v63 = vand.u32 4294901760, %v364_v57  ;;  %v403_v0 = vand.u32 4294901760, %v3271_v54  ;;  %v384_v1 = vsub.f32 %v3246_v43, %v383_v56  ;;  %p3073_p4 = pnand %p3072_p3, %p3066_p0 }
  0x14   :  { %2766 = vmatprep.mubr.msk.f32.mxu0 %vm36_vm0, %v3150_v9  ;;  %2842 = vmatprep.mubr.f32.mxu1 %v363_v46  ;;  %v3294_v2 = vsub.f32 %v56_v49, %v3278_v58  ;;  %v375_v3 = vand.u32 4294901760, %v374_v59  ;;  %v3298_v4 = vsub.f32 %v59_v55, %v3284_v61  ;;  %v413_v5 = vand.u32 4294901760, %v3282_v60 }
  0x15   :  { %2800 = vmatprep.subr.mxu0 %v486_v50  ;;  %v394_v6 = vsub.f32 %v3264_v52, %v393_v62  ;;  %v385_v8 = vand.u32 4294901760, %v384_v1  ;;  %v404_v9 = vsub.f32 %v3271_v54, %v403_v0  ;;  %v443_v17 = vand.u32 4294901760, %v3201_v25 }
  0x16   :  { %v423_v11 = vand.u32 4294901760, %v3294_v2  ;;  %v433_v14 = vand.u32 4294901760, %v3298_v4  ;;  %v414_v15 = vsub.f32 %v3282_v60, %v413_v5  ;;  %v473_v32 = vand.u32 4294901760, %v3259_v48 }
  0x17   :  { %2767 = vmatmul.mubr.msk.f32.gmra.mrb[8].mxu0 %vm36_vm0, %v3163_v12  ;;  %2843 = vmatmul.mubr.f32.vlgmr.msra.gmra.mrb[8].mxu1 %v373_v51  ;;  %v395_v12 = vand.u32 4294901760, %v394_v6  ;;  %v405_v16 = vand.u32 4294901760, %v404_v9  ;;  %v444_v30 = vsub.f32 %v3201_v25, %v443_v17 }
  0x18   :  { %2769 = vmatprep.mubr.msk.f32.mxu0 %vm36_vm0, %v3189_v21  ;;  %2845 = vmatprep.mubr.f32.mxu1 %v383_v56  ;;  %v424_v18 = vsub.f32 %v3294_v2, %v423_v11  ;;  %v415_v19 = vand.u32 4294901760, %v414_v15  ;;  %v453_v21 = vand.u32 4294901760, %v3223_v33  ;;  %v434_v22 = vsub.f32 %v3298_v4, %v433_v14 }
  0x19   :  { %2861 = vmatpush3.msra.mxu1 %v484_v38  ;;  %v445_v37 = vand.u32 4294901760, %v444_v30  ;;  %v474_v45 = vsub.f32 %v3259_v48, %v473_v32 }
  0x1a   :  { %2880 = vmatprep.subr.mxu1 %v3141_v7  ;;  %v425_v24 = vand.u32 4294901760, %v424_v18  ;;  %v435_v31 = vand.u32 4294901760, %v434_v22  ;;  %v454_v34 = vsub.f32 %v3223_v33, %v453_v21 }
  0x1b   :  { %2770 = vmatmul.mubr.msk.f32.gmra.mrb[10].mxu0 %vm36_vm0, %v29_v27  ;;  %2846 = vmatmul.mubr.f32.gmra.mrb[10].mxu1 %v393_v62  ;;  %v463_v27 = vand.u32 4294901760, %v3241_v41  ;;  %v475_v46 = vand.u32 4294901760, %v474_v45 }
  0x1c   :  { %2782 = vmatprep.mubr.f32.mxu0 %v365_v63  ;;  %2848 = vmatprep.mubr.f32.mxu1 %v403_v0  ;;  %v455_v40 = vand.u32 4294901760, %v454_v34 }
  0x1d   :  { %v464_v38 = vsub.f32 %v3241_v41, %v463_v27 }
  0x1f   :  { %2783 = vmatmul.mubr.f32.vlgmr.msra.gmra.mrb[12].mxu0 %v375_v3  ;;  %2849 = vmatmul.mubr.f32.gmra.mrb[12].mxu1 %v413_v5  ;;  %v465_v25 = vand.u32 4294901760, %v464_v38 }
  0x20   :  { %2801 = vmatpush3.msra.mxu0 %v486_v50  ;;  %2785 = vmatprep.mubr.f32.mxu0 %v385_v8 }
  0x21   :  { %2851 = vmatprep.mubr.f32.mxu1 %v423_v11  ;;  %2820 = vmatprep.subr.mxu0 %v3155_v10 }
  0x23   :  { %2786 = vmatmul.mubr.f32.gmra.mrb[14].mxu0 %v395_v12  ;;  %2852 = vmatmul.mubr.f32.gmra.mrb[14].mxu1 %v433_v14 }
  0x24   :  { %2788 = vmatprep.mubr.f32.mxu0 %v405_v16  ;;  %2854 = vmatprep.mubr.f32.mxu1 %v443_v17 }
  0x27   :  { %2789 = vmatmul.mubr.f32.gmra.mrb[16].mxu0 %v415_v19  ;;  %2855 = vmatmul.mubr.f32.gmra.mrb[4].mxu1 %v453_v21 }
  0x28   :  { %2791 = vmatprep.mubr.f32.mxu0 %v425_v24  ;;  %2857 = vmatprep.mubr.f32.mxu1 %v463_v27 }
  0x2b   :  { %2792 = vmatmul.mubr.f32.gmra.mrb[18].mxu0 %v435_v31  ;;  %2858 = vmatmul.mubr.f32.gmra.mrb[6].mxu1 %v473_v32 }
  0x2c   :  { %2794 = vmatprep.mubr.f32.mxu0 %v445_v37  ;;  %2862 = vmatprep.mubr.f32.mxu1 %v3165_v13 }
  0x2f   :  { %2795 = vmatmul.mubr.f32.gmra.mrb[20].mxu0 %v455_v40  ;;  %2863 = vmatmul.mubr.f32.vlgmr.msra.gmra.mrb[8].mxu1 %v3195_v23 }
  0x30   :  { %2797 = vmatprep.mubr.f32.mxu0 %v465_v25  ;;  %2865 = vmatprep.mubr.f32.mxu1 %v3211_v29 }
  0x31   :  { %2881 = vmatpush3.msra.mxu1 %v3141_v7 }
  0x33   :  { %2798 = vmatmul.mubr.f32.gmra.mrb[22].mxu0 %v475_v46  ;;  %2866 = vmatmul.mubr.f32.gmra.mrb[10].mxu1 %v3230_v36 }
  0x34   :  { %2802 = vmatprep.mubr.f32.mxu0 %v3165_v13  ;;  %2868 = vmatprep.mubr.f32.mxu1 %v3248_v44 }
  0x37   :  { %2803 = vmatmul.mubr.f32.vlgmr.msra.gmra.mrb[12].mxu0 %v3195_v23  ;;  %2869 = vmatmul.mubr.f32.gmra.mrb[12].mxu1 %v3266_v53 }
  0x38   :  { %2821 = vmatpush3.msra.mxu0 %v3155_v10  ;;  %2805 = vmatprep.mubr.f32.mxu0 %v3211_v29 }
  0x39   :  { %2871 = vmatprep.mubr.f32.mxu1 %v3278_v58 }
  0x3b   :  { %2806 = vmatmul.mubr.f32.gmra.mrb[14].mxu0 %v3230_v36  ;;  %2872 = vmatmul.mubr.f32.gmra.mrb[14].mxu1 %v3284_v61 }
  0x3c   :  { %2808 = vmatprep.mubr.f32.mxu0 %v3248_v44  ;;  %2874 = vmatprep.mubr.f32.mxu1 %v3184_v20 }
  0x3f   :  { %2809 = vmatmul.mubr.f32.gmra.mrb[16].mxu0 %v3266_v53  ;;  %2875 = vmatmul.mubr.f32.gmra.mrb[4].mxu1 %v3203_v26 }
  0x40   :  { %2811 = vmatprep.mubr.f32.mxu0 %v3278_v58  ;;  %2877 = vmatprep.mubr.f32.mxu1 %v3228_v35 }
  0x43   :  { %2812 = vmatmul.mubr.f32.gmra.mrb[18].mxu0 %v3284_v61  ;;  %2878 = vmatmul.mubr.f32.gmra.mrb[6].mxu1 %v3243_v42 }
  0x44   :  { %2814 = vmatprep.mubr.f32.mxu0 %v3184_v20  ;;  %2882 = vmatprep.mubr.f32.mxu1 %v3165_v13 }
  0x47   :  { %2815 = vmatmul.mubr.f32.gmra.mrb[20].mxu0 %v3203_v26  ;;  %2883 = vmatmul.mubr.f32.vlgmr.msra.gmra.mrb[8].mxu1 %v3195_v23 }
  0x48   :  { %2817 = vmatprep.mubr.f32.mxu0 %v3228_v35  ;;  %2885 = vmatprep.mubr.f32.mxu1 %v3211_v29 }
  0x4b   :  { %2818 = vmatmul.mubr.f32.gmra.mrb[22].mxu0 %v3243_v42  ;;  %2886 = vmatmul.mubr.f32.gmra.mrb[10].mxu1 %v3230_v36 }
  0x4c   :  { %2822 = vmatprep.mubr.f32.mxu0 %v3209_v28  ;;  %2888 = vmatprep.mubr.f32.mxu1 %v3248_v44 }
  0x4f   :  { %2823 = vmatmul.mubr.f32.vlgmr.msra.gmra.mrb[12].mxu0 %v3235_v39  ;;  %2889 = vmatmul.mubr.f32.gmra.mrb[12].mxu1 %v3266_v53 }
  0x50   :  { %2825 = vmatprep.mubr.f32.mxu0 %v3246_v43  ;;  %2891 = vmatprep.mubr.f32.mxu1 %v3278_v58 }
  0x53   :  { %2826 = vmatmul.mubr.f32.gmra.mrb[14].mxu0 %v3264_v52  ;;  %2892 = vmatmul.mubr.f32.gmra.mrb[14].mxu1 %v3284_v61 }
  0x54   :  { %2828 = vmatprep.mubr.f32.mxu0 %v3271_v54  ;;  %2894 = vmatprep.mubr.f32.mxu1 %v3184_v20 }
  0x57   :  { %2829 = vmatmul.mubr.f32.gmra.mrb[16].mxu0 %v3282_v60  ;;  %2895 = vmatmul.mubr.f32.gmra.mrb[4].mxu1 %v3203_v26 }
  0x58   :  { %2831 = vmatprep.mubr.f32.mxu0 %v3294_v2  ;;  %2897 = vmatprep.mubr.f32.mxu1 %v3228_v35 }
  0x5b   :  { %2832 = vmatmul.mubr.f32.gmra.mrb[18].mxu0 %v3298_v4  ;;  %2898 = vmatmul.mubr.f32.gmra.mrb[6].mxu1 %v3243_v42 }
  0xd8   :  { %v2756_v7 = vpop.f32.mrb[0].mxu0  ;;  %v3364_v10 = vpop.f32.mrb[0].mxu1 }
  0xd9   :  { %4606 = vst [vmem:[#allocation5_spill] sm:$0xff] %v3364_v10  ;;  %v3366_v13 = vpop.f32.mrb[1].mxu0  ;;  %v3368_v23 = vpop.f32.mrb[1].mxu1  ;;  %vm1275_vm1 = vcmp.lt.f32.partialorder %v2756_v7, 8000.0 }
  0xda   :  { %4607 = vst [vmem:[#allocation6_spill] sm:$0xff] %v3368_v23  ;;  %vm1274_vm2 = vcmp.lt.f32.partialorder %v3366_v13, 8000.0 }
  0xde   :  { %v3370_v20 = vpop.f32.mrb[2].mxu0  ;;  %v3372_v28 = vpop.f32.mrb[2].mxu1 }
  0xdf   :  { %4608 = vst [vmem:[#allocation7_spill] sm:$0xff] %v3372_v28  ;;  %v3374_v26 = vpop.f32.mrb[3].mxu0  ;;  %v3376_v29 = vpop.f32.mrb[3].mxu1  ;;  %vm1277_vm3 = vcmp.lt.f32.partialorder %v3370_v20, 8000.0 }
  0xe0   :  { %4609 = vst [vmem:[#allocation8_spill] sm:$0xff] %v3376_v29  ;;  %vm1276_vm5 = vcmp.lt.f32.partialorder %v3374_v26, 8000.0 }
  0xe2   :  { %v3378_v33 = vpop.f32.mrb[4].mxu0 }
  0xe3   :  { %v3380_v35 = vpop.f32.mrb[5].mxu0 }
  0xe6   :  { %v3382_v36 = vpop.f32.mrb[6].mxu0 }
  0xe7   :  { %v3384_v39 = vpop.f32.mrb[7].mxu0 }
  0xe8   :  { %4610 = vst [vmem:[#allocation9_spill] sm:$0xff] %v3384_v39 }
  0xea   :  { %v3386_v41 = vpop.f32.mrb[8].mxu0 }
  0xeb   :  { %v3388_v42 = vpop.f32.mrb[9].mxu0 }
  0xee   :  { %v3390_v43 = vpop.f32.mrb[10].mxu0 }
  0xef   :  { %4611 = vst [vmem:[#allocation10_spill] sm:$0xff] %v3390_v43  ;;  %v3392_v44 = vpop.f32.mrb[11].mxu0 }
  0xf0   :  { %4612 = vst [vmem:[#allocation11_spill] sm:$0xff] %v3392_v44 }
 0x11a   :  { %v2816_v47 = vpop.f32.mrb[20].mxu0  ;;  %v2884_v48 = vpop.f32.mrb[8].mxu1 }
 0x11b   :  { %v3394_v49 = vpop.f32.mrb[21].mxu0  ;;  %v1144_v50 = vpop.f32.mrb[9].mxu1 }
 0x11e   :  { %v3396_v51 = vpop.f32.mrb[22].mxu0  ;;  %v2887_v52 = vpop.f32.mrb[10].mxu1 }
 0x11f   :  { %v3398_v53 = vpop.f32.mrb[23].mxu0  ;;  %v1156_v54 = vpop.f32.mrb[11].mxu1 }
 0x122   :  { %v2824_v55 = vpop.f32.mrb[12].mxu0  ;;  %v2890_v56 = vpop.f32.mrb[12].mxu1 }
 0x123   :  { %v2902_v57 = vadd.f32 %v2884_v48, %v2824_v55  ;;  %v693_v58 = vpop.f32.mrb[13].mxu0  ;;  %v1168_v59 = vpop.f32.mrb[13].mxu1 }
 0x124   :  { %v2903_v60 = vadd.f32 %v1144_v50, %v693_v58 }
 0x125   :  { %v1215_v61 = vmul.f32 0.0003926991, %v2902_v57 }
 0x126   :  { %v1214_v62 = vmul.f32 0.0003926991, %v2903_v60  ;;  %v2827_v63 = vpop.f32.mrb[14].mxu0  ;;  %v3400_v0 = vpop.f32.mrb[14].mxu1 }
 0x127   :  { %v1227_v1 = vmul.f32 0.15915494, %v1215_v61  ;;  %v2904_v2 = vadd.f32 %v2887_v52, %v2827_v63  ;;  %v707_v3 = vpop.f32.mrb[15].mxu0  ;;  %v3402_v4 = vpop.f32.mrb[15].mxu1 }
 0x128   :  { %v1226_v5 = vmul.f32 0.15915494, %v1214_v62  ;;  %v2905_v6 = vadd.f32 %v1156_v54, %v707_v3 }
 0x129   :  { %v1239_v8 = vfloor.f32 %v1227_v1  ;;  %v1217_v9 = vmul.f32 0.0003926991, %v2904_v2 }
 0x12a   :  { %v1238_v11 = vfloor.f32 %v1226_v5  ;;  %v1216_v12 = vmul.f32 0.0003926991, %v2905_v6  ;;  %v2830_v14 = vpop.f32.mrb[16].mxu0  ;;  %v2896_v15 = vpop.f32.mrb[4].mxu1  ;;  %v4588_v5 = vmov 683565275  }
 0x12b   :  { %v1251_v16 = vmul.f32 6.2831855, %v1239_v8  ;;  %v1229_v17 = vmul.f32 0.15915494, %v1217_v9  ;;  %v3404_v18 = vadd.f32 %v2890_v56, %v2830_v14  ;;  %v3406_v19 = vadd.f32 %v2896_v15, %v2816_v47  ;;  %v721_v21 = vpop.f32.mrb[17].mxu0  ;;  %v3412_v38 = vpop.f32.mrb[5].mxu1 }
 0x12c   :  { %v1250_v22 = vmul.f32 6.2831855, %v1238_v11  ;;  %v1228_v24 = vmul.f32 0.15915494, %v1216_v12  ;;  %v3408_v27 = vadd.f32 %v1168_v59, %v721_v21  ;;  %v4586_v11 = vmov 2131351028  }
 0x12d   :  { %v1263_v30 = vsub.f32 %v1215_v61, %v1251_v16  ;;  %v1241_v31 = vfloor.f32 %v1229_v17  ;;  %v4577_v14 = vmov 2102212464   ;;  %v4579_v16 = vmov 920167782  }
 0x12e   :  { %v1262_v32 = vsub.f32 %v1214_v62, %v1250_v22  ;;  %v1240_v25 = vfloor.f32 %v1228_v24 }
 0x12f   :  { %v3410_v34 = vsel %vm1275_vm1, %v1263_v30, 0.0  ;;  %v1253_v37 = vmul.f32 6.2831855, %v1241_v31 }
 0x130   :  { %4613 = vst [vmem:[#allocation12_spill] sm:$0xff] %v3410_v34  ;;  %v1402_v40 = vand.u32 2147483647, %v3410_v34  ;;  %v1405_v45 = vand.u32 2139095040, %v3410_v34  ;;  %v3417_v46 = vsel %vm1274_vm2, %v1262_v32, 0.0  ;;  %vm1279_vm2 = vcmp.lt.f32.partialorder %v3378_v33, 8000.0 }
 0x131   :  { %4614 = vst [vmem:[#allocation13_spill] sm:$0xff] %v3417_v46  ;;  %v1265_v47 = vsub.f32 %v1217_v9, %v1253_v37  ;;  %v1301_v7 = vand.u32 2139095040, %v3417_v46  ;;  %v1252_v13 = vmul.f32 6.2831855, %v1240_v25  ;;  %v4576_v57 = vand.u32 2147483647, %v3417_v46 }
 0x132   :  { %v1406_v48 = vshrl.u32 %v1405_v45, 23  ;;  %v1409_v54 = vand.u32 8388607, %v1402_v40  ;;  %v4584_v9 = vmov 2475754826  }
 0x133   :  { %v3421_v50 = vsel %vm1277_vm3, %v1265_v47, 0.0  ;;  %v1302_v55 = vshrl.u32 %v1301_v7, 23  ;;  %v1264_v60 = vsub.f32 %v1216_v12, %v1252_v13  ;;  %v3431_v2 = vand.u32 8388607, %v4576_v57 }
 0x134   :  { %4615 = vst [vmem:[#allocation14_spill] sm:$0xff] %v3421_v50  ;;  %v2612_v52 = vadd.s32 4294967169, %v1406_v48  ;;  %v1410_v59 = vor.u32 8388608, %v1409_v54  ;;  %v4574_v32 = vmov 1326507024  }
 0x135   :  { %v2608_v58 = vadd.s32 4294967169, %v1302_v55  ;;  %v3427_v1 = vsel %vm1276_vm5, %v1264_v60, 0.0 }
 0x136   :  { %v1412_v56 = vadd.s32 1, %v2612_v52  ;;  %4616 = vst [vmem:[#allocation15_spill] sm:$0xff] %v3427_v1  ;;  %v3434_v8 = vshll.u32 %v1410_v59, 8 }
 0x137   :  { %v1308_v61 = vadd.s32 1, %v2608_v58 }
 0x138   :  { %vm1413_vm4 = vcmp.gt.s32.totalorder %v1412_v56, 0 }
 0x139   :  { %v1414_v20 = vsel %vm1413_vm4, %v1412_v56, 0  ;;  %vm1309_vm6 = vcmp.gt.s32.totalorder %v1308_v61, 0 }
 0x13a   :  { %v1415_v62 = vshrl.u32 %v1414_v20, 5  ;;  %v1416_v63 = vand.u32 31, %v1414_v20  ;;  %v1310_v48 = vsel %vm1309_vm6, %v1308_v61, 0 }
 0x13b   :  { %v1312_v54 = vand.u32 31, %v1310_v48 }
 0x13c   :  { %v1417_v3 = vsub.s32 32, %v1416_v63  ;;  %v1419_v6 = vshll.u32 %v4588_v5, %v1416_v63  ;;  %v1422_v26 = vshll.u32 %v4584_v9, %v1416_v63  ;;  %v1425_v12 = vshll.u32 %v4586_v11, %v1416_v63 }
 0x13d   :  { %v1428_v15 = vshll.u32 %v4577_v14, %v1416_v63  ;;  %v1431_v17 = vshll.u32 %v4579_v16, %v1416_v63  ;;  %vm1434_vm7 = vcmp.lt.s32.totalorder %v1415_v62, 1  ;;  %vm1436_vm8 = vcmp.lt.s32.totalorder %v1415_v62, 3 }
 0x13e   :  { %v1420_v21 = vshrl.u32 %v4584_v9, %v1417_v3  ;;  %v1423_v22 = vshrl.u32 %v4586_v11, %v1417_v3  ;;  %v1426_v24 = vshrl.u32 %v4577_v14, %v1417_v3  ;;  %v1418_v30 = vshrl.u32 %v4588_v5, %v1417_v3 }
 0x13f   :  { %v1429_v31 = vshrl.u32 %v4579_v16, %v1417_v3  ;;  %v1432_v37 = vshrl.u32 %v4574_v32, %v1417_v3  ;;  %vm1437_vm9 = vcmp.lt.s32.totalorder %v1415_v62, 4  ;;  %v1313_v63 = vsub.s32 32, %v1312_v54 }
 0x140   :  { %v1421_v45 = vor.u32 %v1420_v21, %v1419_v6  ;;  %v1424_v25 = vor.u32 %v1423_v22, %v1422_v26  ;;  %v1427_v47 = vor.u32 %v1426_v24, %v1425_v12  ;;  %vm1435_vm10 = vcmp.lt.s32.totalorder %v1415_v62, 2 }
 0x141   :  { %v1430_v7 = vor.u32 %v1429_v31, %v1428_v15  ;;  %v1433_v52 = vor.u32 %v1432_v37, %v1431_v17  ;;  %v1306_v6 = vor.u32 8388608, %v3431_v2  ;;  %v1311_v17 = vshrl.u32 %v1310_v48, 5 }
 0x142   :  { %v1438_v13 = vsel %vm1434_vm7, %v1418_v30, %v1421_v45  ;;  %v1439_v55 = vsel %vm1437_vm9, %v1427_v47, 2102212464  ;;  %v1442_v56 = vsel %vm1434_vm7, %v1421_v45, %v1424_v25  ;;  %v1446_v58 = vsel %vm1434_vm7, %v1424_v25, %v1427_v47 }
 0x143   :  { %v1440_v59 = vsel %vm1436_vm8, %v1424_v25, %v1439_v55  ;;  %v1443_v60 = vsel %vm1437_vm9, %v1430_v7, 920167782  ;;  %v1447_v20 = vsel %vm1437_vm9, %v1433_v52, 1326507024  ;;  %v1315_v31 = vshll.u32 %v4588_v5, %v1312_v54 }
 0x144   :  { %v1444_v3 = vsel %vm1436_vm8, %v1427_v47, %v1443_v60  ;;  %v1448_v61 = vsel %vm1436_vm8, %v1430_v7, %v1447_v20  ;;  %v1441_v26 = vsel %vm1435_vm10, %v1438_v13, %v1440_v59  ;;  %v1316_v62 = vshrl.u32 %v4584_v9, %v1313_v63 }
 0x145   :  { %v1445_v12 = vsel %vm1435_vm10, %v1442_v56, %v1444_v3  ;;  %v1449_v15 = vsel %vm1435_vm10, %v1446_v58, %v1448_v61  ;;  %v1318_v37 = vshll.u32 %v4584_v9, %v1312_v54  ;;  %v1319_v2 = vshrl.u32 %v4586_v11, %v1313_v63 }
 0x146   :  { %v3455_v21 = vmul.u32.u64.low %v3434_v8, %v1449_v15  ;;  %v3456_v22 = vmul.u32.u64.high %v3434_v8, %v1449_v15, %v3455_v21  ;;  %v3459_v24 = vmul.u32.u64.low %v3434_v8, %v1445_v12  ;;  %v3460_v30 = vmul.u32.u64.high %v3434_v8, %v1445_v12, %v3459_v24 }
 0x147   :  { %v1321_v45 = vshll.u32 %v4586_v11, %v1312_v54  ;;  %v1322_v25 = vshrl.u32 %v4577_v14, %v1313_v63  ;;  %v1324_v47 = vshll.u32 %v4577_v14, %v1312_v54  ;;  %v1325_v48 = vshrl.u32 %v4579_v16, %v1313_v63 }
 0x148   :  { %v1317_v7 = vor.u32 %v1316_v62, %v1315_v31  ;;  %v1320_v52 = vor.u32 %v1319_v2, %v1318_v37  ;;  %v1327_v13 = vshll.u32 %v4579_v16, %v1312_v54  ;;  %v1328_v55 = vshrl.u32 %v4574_v32, %v1313_v63 }
 0x149   :  { %v1457_v56 = vmul.u32 %v3434_v8, %v1441_v26  ;;  %vm1459_vm11 = vc.u32 %v3456_v22, %v3459_v24  ;;  %v1460_v58 = vadd.s32 1, %v3460_v30  ;;  %v1323_v59 = vor.u32 %v1322_v25, %v1321_v45  ;;  %v3481_v25 = vpop.f32.mrb[18].mxu0 }
 0x14a   :  { %v1314_v60 = vshrl.u32 %v4588_v5, %v1313_v63  ;;  %v1326_v20 = vor.u32 %v1325_v48, %v1324_v47  ;;  %v1329_v3 = vor.u32 %v1328_v55, %v1327_v13  ;;  %vm1330_vm12 = vcmp.lt.s32.totalorder %v1311_v17, 1 }
 0x14b   :  { %v1461_v61 = vsel %vm1459_vm11, %v1460_v58, %v3460_v30  ;;  %vm1332_vm13 = vcmp.lt.s32.totalorder %v1311_v17, 3  ;;  %vm1333_vm14 = vcmp.lt.s32.totalorder %v1311_v17, 4  ;;  %v1338_v54 = vsel %vm1330_vm12, %v1317_v7, %v1320_v52 }
 0x14c   :  { %v1462_v12 = vadd.s32 %v1461_v61, %v1457_v56  ;;  %v1335_v15 = vsel %vm1333_vm14, %v1323_v59, 2102212464  ;;  %v1339_v21 = vsel %vm1333_vm14, %v1326_v20, 920167782  ;;  %v1342_v8 = vsel %vm1330_vm12, %v1320_v52, %v1323_v59 }
 0x14d   :  { %vm1331_vm15 = vcmp.lt.s32.totalorder %v1311_v17, 2  ;;  %v1340_v26 = vsel %vm1332_vm13, %v1323_v59, %v1339_v21  ;;  %v1343_v31 = vsel %vm1333_vm14, %v1329_v3, 1326507024  ;;  %v1346_v62 = vshll.u32 %v1306_v6, 8 }
 0x14e   :  { %v1463_v37 = vadd.s32 536870912, %v1462_v12  ;;  %v1334_v2 = vsel %vm1330_vm12, %v1314_v60, %v1317_v7  ;;  %v1341_v63 = vsel %vm1331_vm15, %v1338_v54, %v1340_v26  ;;  %v1344_v45 = vsel %vm1332_vm13, %v1326_v20, %v1343_v31 }
 0x14f   :  { %v1336_v30 = vsel %vm1332_vm13, %v1320_v52, %v1335_v15  ;;  %v1345_v47 = vsel %vm1331_vm15, %v1342_v8, %v1344_v45  ;;  %v3484_v48 = vmul.u32.u64.low %v1346_v62, %v1341_v63  ;;  %v3485_v13 = vmul.u32.u64.high %v1346_v62, %v1341_v63, %v3484_v48 }
 0x150   :  { %v3488_v55 = vshrl.u32 %v1463_v37, 30  ;;  %v3490_v56 = vmul.u32.u64.low %v1346_v62, %v1345_v47  ;;  %v3491_v58 = vmul.u32.u64.high %v1346_v62, %v1345_v47, %v3490_v56  ;;  %v1337_v6 = vsel %vm1331_vm15, %v1334_v2, %v1336_v30 }
 0x151   :  { %v1613_v7 = vand.u32 2139095040, %v3421_v50  ;;  %v1356_v59 = vadd.s32 1, %v3485_v13  ;;  %v1353_v17 = vmul.u32 %v1346_v62, %v1337_v6  ;;  %v1219_v54 = vmul.f32 0.0003926991, %v3404_v18  ;;  %v3509_v18 = vpop.f32.mrb[6].mxu1 }
 0x152   :  { %v1465_v60 = vshll.u32 %v3488_v55, 30  ;;  %vm1355_vm0 = vc.u32 %v3491_v58, %v3484_v48  ;;  %vm1404_vm9 = vcmp.lt.s32.totalorder %v3410_v34, 0  ;;  %vm3580_vm10 = vcmp.le.f32.partialorder %v1402_v40, 0.7853982 }
 0x153   :  { %v1357_v52 = vsel %vm1355_vm0, %v1356_v59, %v3485_v13  ;;  %v1614_v20 = vshrl.u32 %v1613_v7, 23  ;;  %v1231_v26 = vmul.f32 0.15915494, %v1219_v54  ;;  %v3513_v7 = vadd.f32 %v3412_v38, %v3394_v49 }
 0x154   :  { %v1358_v3 = vadd.s32 %v1357_v52, %v1353_v17  ;;  %v3499_v61 = vsub.s32 %v1462_v12, %v1465_v60  ;;  %vm1300_vm11 = vcmp.lt.s32.totalorder %v3417_v46, 0  ;;  %vm1283_vm12 = vcmp.lt.f32.partialorder %v3386_v41, 8000.0 }
 0x155   :  { %v2620_v15 = vadd.s32 4294967169, %v1614_v20  ;;  %v1243_v63 = vfloor.f32 %v1231_v26 }
 0x156   :  { %v1359_v21 = vadd.s32 536870912, %v1358_v3  ;;  %v1468_v8 = vsub.s32 0, %v3499_v61 }
 0x157   :  { %v1620_v31 = vadd.s32 1, %v2620_v15  ;;  %v1255_v30 = vmul.f32 6.2831855, %v1243_v63 }
 0x158   :  { %v3503_v37 = vshrl.u32 %v1359_v21, 30  ;;  %v2613_v2 = vmin.u32 %v1468_v8, %v3499_v61 }
 0x159   :  { %vm1621_vm1 = vcmp.gt.s32.totalorder %v1620_v31, 0  ;;  %v1267_v6 = vsub.f32 %v1219_v54, %v1255_v30  ;;  %v4582_v54 = vand.u32 2147483647, %v3421_v50 }
 0x15a   :  { %v1361_v62 = vshll.u32 %v3503_v37, 30  ;;  %v1470_v45 = vclz %v2613_v2  ;;  %v1622_v12 = vsel %vm1621_vm1, %v1620_v31, 0  ;;  %vm1278_vm1 = vcmp.lt.f32.partialorder %v3380_v35, 8000.0 }
 0x15b   :  { %v1624_v56 = vand.u32 31, %v1622_v12  ;;  %v3519_v17 = vsel %vm1279_vm2, %v1267_v6, 0.0  ;;  %v3527_v33 = vshrl.u32 %v1622_v12, 5  ;;  %v1617_v6 = vand.u32 8388607, %v4582_v54 }
 0x15c   :  { %v3507_v47 = vsub.s32 %v1358_v3, %v1361_v62  ;;  %v2614_v13 = vadd.s32 4294967294, %v1470_v45 }
 0x15d   :  { %v3517_v60 = vsub.s32 32, %v1624_v56  ;;  %v1636_v21 = vshll.u32 %v4577_v14, %v1624_v56  ;;  %v1639_v2 = vshll.u32 %v4579_v16, %v1624_v56  ;;  %v1627_v63 = vshll.u32 %v4588_v5, %v1624_v56 }
 0x15e   :  { %v1364_v59 = vsub.s32 0, %v3507_v47  ;;  %vm2615_vm3 = vcmp.lt.s32.totalorder %v2614_v13, 0  ;;  %v1630_v45 = vshll.u32 %v4584_v9, %v1624_v56  ;;  %v1633_v30 = vshll.u32 %v4586_v11, %v1624_v56 }
 0x15f   :  { %v1473_v52 = vsel %vm2615_vm3, 0, %v2614_v13  ;;  %v1637_v3 = vshrl.u32 %v4579_v16, %v3517_v60  ;;  %v1640_v49 = vshrl.u32 %v4574_v32, %v3517_v60  ;;  %v1628_v15 = vshrl.u32 %v4584_v9, %v3517_v60 }
 0x160   :  { %v2609_v20 = vmin.u32 %v1364_v59, %v3507_v47  ;;  %v1478_v38 = vsub.s32 4294967266, %v1473_v52  ;;  %v1631_v26 = vshrl.u32 %v4586_v11, %v3517_v60  ;;  %v1634_v31 = vshrl.u32 %v4577_v14, %v3517_v60 }
 0x161   :  { %v1638_v62 = vor.u32 %v1637_v3, %v1636_v21  ;;  %v1641_v12 = vor.u32 %v1640_v49, %v1639_v2  ;;  %v1629_v59 = vor.u32 %v1628_v15, %v1627_v63  ;;  %vm1645_vm4 = vcmp.lt.s32.totalorder %v3527_v33, 4 }
 0x162   :  { %v1366_v8 = vclz %v2609_v20  ;;  %v1479_v13 = vadd.s32 127, %v1478_v38  ;;  %v1632_v32 = vor.u32 %v1631_v26, %v1630_v45  ;;  %v1635_v57 = vor.u32 %v1634_v31, %v1633_v30 }
 0x163   :  { %v1474_v14 = vsub.s32 32, %v1473_v52  ;;  %v1651_v16 = vsel %vm1645_vm4, %v1638_v62, 920167782  ;;  %v1458_v3 = vadd.s32 %v3459_v24, %v3456_v22  ;;  %v1655_v56 = vsel %vm1645_vm4, %v1641_v12, 1326507024 }
 0x164   :  { %v2610_v20 = vadd.s32 4294967294, %v1366_v8  ;;  %v3550_v49 = vmul.f32 0.0003926991, %v3406_v19  ;;  %v1480_v38 = vshll.u32 %v1479_v13, 23  ;;  %vm1642_vm5 = vcmp.lt.s32.totalorder %v3527_v33, 1 }
 0x165   :  { %vm1644_vm6 = vcmp.lt.s32.totalorder %v3527_v33, 3  ;;  %v1509_v15 = vand.u32 2139095040, %v3427_v1  ;;  %v1618_v21 = vor.u32 8388608, %v1617_v6  ;;  %v1650_v8 = vsel %vm1642_vm5, %v1629_v59, %v1632_v32 }
 0x166   :  { %vm2611_vm7 = vcmp.lt.s32.totalorder %v2610_v20, 0  ;;  %v1652_v22 = vsel %vm1644_vm6, %v1635_v57, %v1651_v16  ;;  %v1476_v24 = vshrl.u32 %v1458_v3, %v1474_v14  ;;  %v1488_v26 = vsub.s32 4, %v3488_v55 }
 0x167   :  { %v1654_v19 = vsel %vm1642_vm5, %v1632_v32, %v1635_v57  ;;  %v1656_v31 = vsel %vm1644_vm6, %v1638_v62, %v1655_v56  ;;  %v1475_v2 = vshll.u32 %v3499_v61, %v1473_v52  ;;  %vm1643_vm8 = vcmp.lt.s32.totalorder %v3527_v33, 2 }
 0x168   :  { %v1481_v63 = vor.u32 4788187, %v1480_v38  ;;  %v3566_v45 = vsel %vm2611_vm7, 0, %v2610_v20  ;;  %v1653_v30 = vsel %vm1643_vm8, %v1650_v8, %v1652_v22  ;;  %v1510_v16 = vshrl.u32 %v1509_v15, 23  ;;  %v3588_v20 = vpop.f32.mrb[19].mxu0 }
 0x169   :  { %v1657_v14 = vsel %vm1643_vm8, %v1654_v19, %v1656_v31  ;;  %v3573_v12 = vshll.u32 %v1618_v21, 8  ;;  %v3576_v62 = vmul.f32 0.0003926991, %v3408_v27  ;;  %v1477_v52 = vor.u32 %v1476_v24, %v1475_v2 }
 0x16a   :  { %v1489_v13 = vsel %vm1404_vm9, %v1488_v26, %v3488_v55  ;;  %v1235_v6 = vmul.f32 0.15915494, %v3550_v49  ;;  %v1374_v3 = vsub.s32 4294967266, %v3566_v45  ;;  %v1384_v27 = vsub.s32 4, %v3503_v37 }
 0x16b   :  { %v3593_v56 = vmul.u32.u64.low %v3573_v12, %v1653_v30  ;;  %v3594_v38 = vmul.u32.u64.high %v3573_v12, %v1653_v30, %v3593_v56  ;;  %v1482_v40 = vand.u32 2147483647, %v1481_v63  ;;  %v2616_v8 = vadd.s32 4294967169, %v1510_v16 }
 0x16c   :  { %v3598_v15 = vmul.u32.u64.low %v3573_v12, %v1657_v14  ;;  %v3599_v21 = vmul.u32.u64.high %v3573_v12, %v1657_v14, %v3598_v15  ;;  %v1626_v55 = vshrl.u32 %v4588_v5, %v3517_v60  ;;  %v1647_v22 = vsel %vm1645_vm4, %v1635_v57, 2102212464 }
 0x16d   :  { %4619 = vst [vmem:[#allocation16_spill] sm:$0xff] %v3593_v56  ;;  %v4581_v24 = vand.u32 2147483647, %v3427_v1  ;;  %v1821_v26 = vand.u32 2139095040, %v3519_v17  ;;  %v1484_v19 = vcvt.s32.f32 %v1477_v52  ;;  %v1491_v31 = vsel %vm3580_vm10, 0, %v1489_v13 }
 0x16e   :  { %4620 = vst [vmem:[#allocation17_spill] sm:$0xff] %v3599_v21  ;;  %v1247_v2 = vfloor.f32 %v1235_v6  ;;  %v1375_v63 = vadd.s32 127, %v1374_v3  ;;  %v1385_v30 = vsel %vm1300_vm11, %v1384_v27, %v3503_v37  ;;  %v1646_v60 = vsel %vm1642_vm5, %v1626_v55, %v1629_v59 }
 0x16f   :  { %v1822_v57 = vshrl.u32 %v1821_v26, 23  ;;  %v1485_v16 = vmul.f32 %v1484_v19, %v1482_v40  ;;  %v1648_v14 = vsel %vm1644_vm6, %v1632_v32, %v1647_v22  ;;  %v1516_v52 = vadd.s32 1, %v2616_v8 }
 0x170   :  { %v1259_v15 = vmul.f32 6.2831855, %v1247_v2  ;;  %v4621_v13 = vand.u32 2147483647, %v3417_v46  ;;  %v1513_v37 = vand.u32 8388607, %v4581_v24  ;;  %v1354_v27 = vadd.s32 %v3484_v48, %v3491_v58 }
 0x171   :  { %v2628_v3 = vadd.s32 4294967169, %v1822_v57  ;;  %v1495_v59 = vadd.s32 3, %v1491_v31  ;;  %v1370_v32 = vsub.s32 32, %v3566_v45  ;;  %v1376_v8 = vshll.u32 %v1375_v63, 23 }
 0x172   :  { %vm3620_vm13 = vcmp.le.f32.partialorder %v4621_v13, 0.7853982  ;;  %v1649_v55 = vsel %vm1643_vm8, %v1646_v60, %v1648_v14  ;;  %v1668_v22 = vadd.s32 1, %v3594_v38  ;;  %v1486_v19 = vxor.u32 2147483648, %v1485_v16 }
 0x173   :  { %v1387_v40 = vsel %vm3620_vm13, 0, %v1385_v30  ;;  %v1828_v26 = vadd.s32 1, %v2628_v3  ;;  %vm1667_vm14 = vc.u32 %v3599_v21, %v3593_v56  ;;  %vm1517_vm15 = vcmp.gt.s32.totalorder %v1516_v52, 0 }
 0x174   :  { %v1271_v31 = vsub.f32 %v3550_v49, %v1259_v15  ;;  %v1391_v48 = vadd.s32 3, %v1387_v40  ;;  %v1514_v58 = vor.u32 8388608, %v1513_v37  ;;  %v4583_v2 = vand.u32 2147483647, %v3519_v17 }
 0x175   :  { %vm1829_vm0 = vcmp.gt.s32.totalorder %v1828_v26, 0  ;;  %v1372_v30 = vshrl.u32 %v1354_v27, %v1370_v32  ;;  %v1230_v60 = vmul.f32 0.15915494, %v3576_v62  ;;  %v1377_v57 = vor.u32 4788187, %v1376_v8 }
 0x176   :  { %v1830_v63 = vsel %vm1829_vm0, %v1828_v26, 0  ;;  %v3640_v33 = vsel %vm1283_vm12, %v1271_v31, 0.0  ;;  %v1669_v14 = vsel %vm1667_vm14, %v1668_v22, %v3594_v38  ;;  %v1518_v13 = vsel %vm1517_vm15, %v1516_v52, 0 }
 0x177   :  { %v1832_v3 = vand.u32 31, %v1830_v63  ;;  %v1487_v49 = vsel %vm1404_vm9, %v1486_v19, %v1485_v16  ;;  %v3646_v15 = vand.u32 3, %v1495_v59  ;;  %v1665_v37 = vmul.u32 %v3573_v12, %v1649_v55 }
 0x178   :  { %v1371_v27 = vshll.u32 %v3507_v47, %v3566_v45  ;;  %v3651_v41 = vand.u32 3, %v1391_v48  ;;  %v1825_v32 = vand.u32 8388607, %v4583_v2  ;;  %v3657_v38 = vshrl.u32 %v1518_v13, 5 }
 0x179   :  { %v1833_v40 = vsub.s32 32, %v1832_v3  ;;  %v3655_v8 = vadd.s32 %v1669_v14, %v1665_v37  ;;  %v3659_v52 = vand.u32 31, %v1518_v13  ;;  %v3661_v16 = vshll.u32 %v1514_v58, 8 }
 0x17a   :  { %v1490_v12 = vsel %vm3580_vm10, %v3410_v34, %v1487_v49  ;;  %v1373_v59 = vor.u32 %v1372_v30, %v1371_v27  ;;  %v1378_v47 = vand.u32 2147483647, %v1377_v57  ;;  %v1242_v45 = vfloor.f32 %v1230_v60 }
 0x17b   :  { %v1835_v55 = vshll.u32 %v4588_v5, %v1832_v3  ;;  %v1836_v22 = vshrl.u32 %v4584_v9, %v1833_v40  ;;  %v1838_v26 = vshll.u32 %v4584_v9, %v1832_v3  ;;  %v1839_v19 = vshrl.u32 %v4586_v11, %v1833_v40 }
 0x17c   :  { %v1826_v31 = vor.u32 8388608, %v1825_v32  ;;  %v1831_v48 = vshrl.u32 %v1830_v63, 5  ;;  %v1841_v58 = vshll.u32 %v4586_v11, %v1832_v3  ;;  %v4624_v14 = vmov 2102212464  }
 0x17d   :  { %v1842_v13 = vshrl.u32 %v4624_v14, %v1833_v40  ;;  %v1837_v37 = vor.u32 %v1836_v22, %v1835_v55  ;;  %v1840_v61 = vor.u32 %v1839_v19, %v1838_v26  ;;  %v1844_v30 = vshll.u32 %v4624_v14, %v1832_v3 }
 0x17e   :  { %v4625_v57 = vmov 920167782   ;;  %3017 = vcosq.f32 %v1490_v12  ;;  %v1380_v49 = vcvt.s32.f32 %v1373_v59  ;;  %v4626_v24 = vmov 1326507024  }
 0x17f   :  { %v1845_v60 = vshrl.u32 %v4625_v57, %v1833_v40  ;;  %v1843_v27 = vor.u32 %v1842_v13, %v1841_v58  ;;  %v1848_v54 = vshrl.u32 %v4626_v24, %v1833_v40  ;;  %v1671_v2 = vadd.s32 536870912, %v3655_v8 }
 0x180   :  { %v1847_v63 = vshll.u32 %v4625_v57, %v1832_v3  ;;  %v1254_v32 = vmul.f32 6.2831855, %v1242_v45  ;;  %v1381_v11 = vmul.f32 %v1380_v49, %v1378_v47  ;;  %v1521_v55 = vsub.s32 32, %v3659_v52 }
 0x181   :  { %v1846_v9 = vor.u32 %v1845_v60, %v1844_v30  ;;  %vm1850_vm2 = vcmp.lt.s32.totalorder %v1831_v48, 1  ;;  %v1866_v22 = vshll.u32 %v1826_v31, 8  ;;  %v1834_v26 = vshrl.u32 %v4588_v5, %v1833_v40 }
 0x182   :  { %v1849_v19 = vor.u32 %v1848_v54, %v1847_v63  ;;  %vm1853_vm3 = vcmp.lt.s32.totalorder %v1831_v48, 4  ;;  %v1858_v59 = vsel %vm1850_vm2, %v1837_v37, %v1840_v61  ;;  %vm1852_vm4 = vcmp.lt.s32.totalorder %v1831_v48, 3 }
 0x183   :  { %v1855_v58 = vsel %vm1853_vm3, %v1843_v27, 2102212464  ;;  %v1859_v13 = vsel %vm1853_vm3, %v1846_v9, 920167782  ;;  %v1862_v29 = vsel %vm1850_vm2, %v1840_v61, %v1843_v27  ;;  %vm1851_vm5 = vcmp.lt.s32.totalorder %v1831_v48, 2 }
 0x184   :  { %v1860_v30 = vsel %vm1852_vm4, %v1843_v27, %v1859_v13  ;;  %v1863_v3 = vsel %vm1853_vm3, %v1849_v19, 1326507024  ;;  %v1266_v45 = vsub.f32 %v3576_v62, %v1254_v32  ;;  %v1854_v60 = vsel %vm1850_vm2, %v1834_v26, %v1837_v37  ;;  %v3693_v32 = vpop.f32.mrb[7].mxu1 }
 0x185   :  { %v1861_v47 = vsel %vm1851_vm5, %v1858_v59, %v1860_v30  ;;  %v1864_v49 = vsel %vm1852_vm4, %v1846_v9, %v1863_v3  ;;  %v2237_v31 = vand.u32 2139095040, %v3640_v33  ;;  %v1856_v28 = vsel %vm1852_vm4, %v1840_v61, %v1855_v58 }
 0x186   :  { %v1865_v54 = vsel %vm1851_vm5, %v1862_v29, %v1864_v49  ;;  %v3684_v40 = vmul.u32.u64.low %v1866_v22, %v1861_v47  ;;  %v3685_v63 = vmul.u32.u64.high %v1866_v22, %v1861_v47, %v3684_v40  ;;  %3019 = vsinq.f32 %v1490_v12 }
 0x187   :  { %v1523_v27 = vshll.u32 %v4588_v5, %v3659_v52  ;;  %v4627_v19 = vmov 2475754826   ;;  %v1530_v37 = vshrl.u32 %v4624_v14, %v1521_v55  ;;  %v1533_v61 = vshrl.u32 %v4625_v57, %v1521_v55 }
 0x188   :  { %v1526_v62 = vshll.u32 %v4627_v19, %v3659_v52  ;;  %v1524_v9 = vshrl.u32 %v4627_v19, %v1521_v55  ;;  %v3697_v29 = vmul.u32.u64.low %v1866_v22, %v1865_v54  ;;  %v3698_v26 = vmul.u32.u64.high %v1866_v22, %v1865_v54, %v3697_v29  ;;  %v3700_v59 = vpop.eup %3017 }
 0x189   :  { %v1382_v12 = vxor.u32 2147483648, %v1381_v11  ;;  %v4628_v58 = vmov 2131351028   ;;  %v1857_v30 = vsel %vm1851_vm5, %v1854_v60, %v1856_v28  ;;  %v2238_v3 = vshrl.u32 %v2237_v31, 23 }
 0x18a   :  { %v1529_v13 = vshll.u32 %v4628_v58, %v3659_v52  ;;  %v1527_v47 = vshrl.u32 %v4628_v58, %v1521_v55  ;;  %v1532_v49 = vshll.u32 %v4624_v14, %v3659_v52  ;;  %v1876_v5 = vadd.s32 1, %v3685_v63 }
 0x18b   :  { %v3711_v54 = vsel %vm1278_vm1, %v1266_v45, 0.0  ;;  %v3713_v29 = vshrl.u32 %v1671_v2, 30  ;;  %v4630_v1 = vmov 683565275   ;;  %v2644_v21 = vadd.s32 4294967169, %v2238_v3 }
 0x18c   :  { %4629 = vst [vmem:[#allocation18_spill] sm:$0xff] %v3711_v54  ;;  %v1522_v50 = vshrl.u32 %v4630_v1, %v1521_v55  ;;  %v1531_v56 = vor.u32 %v1530_v37, %v1529_v13  ;;  %v1534_v48 = vor.u32 %v1533_v61, %v1532_v49  ;;  %v1536_v28 = vshrl.u32 %v4626_v24, %v1521_v55 }
 0x18d   :  { %v1873_v60 = vmul.u32 %v1866_v22, %v1857_v30  ;;  %vm1875_vm6 = vc.u32 %v3698_v26, %v3684_v40  ;;  %v1383_v31 = vsel %vm1300_vm11, %v1382_v12, %v1381_v11  ;;  %v4596_v45 = vand.u32 2147483647, %v3640_v33 }
 0x18e   :  { %v1877_v35 = vsel %vm1875_vm6, %v1876_v5, %v3685_v63  ;;  %v2244_v2 = vadd.s32 1, %v2644_v21  ;;  %v1525_v44 = vor.u32 %v1524_v9, %v1523_v27  ;;  %v1528_v23 = vor.u32 %v1527_v47, %v1526_v62 }
 0x18f   :  { %v1535_v37 = vshll.u32 %v4625_v57, %v3659_v52  ;;  %v1878_v61 = vadd.s32 %v1877_v35, %v1873_v60  ;;  %vm1538_vm7 = vcmp.lt.s32.totalorder %v3657_v38, 1  ;;  %vm1539_vm8 = vcmp.lt.s32.totalorder %v3657_v38, 2 }
 0x190   :  { %vm1541_vm9 = vcmp.lt.s32.totalorder %v3657_v38, 4  ;;  %vm2245_vm10 = vcmp.gt.s32.totalorder %v2244_v2, 0  ;;  %v3731_v5 = vsel %vm3620_vm13, %v3417_v46, %v1383_v31  ;;  %v3735_v22 = vpop.eup %3019  ;;  %v2241_v27 = vand.u32 8388607, %v4596_v45 }
 0x191   :  { %v1543_v11 = vsel %vm1541_vm9, %v1531_v56, 2102212464  ;;  %v1879_v21 = vadd.s32 536870912, %v1878_v61  ;;  %v2246_v55 = vsel %vm2245_vm10, %v2244_v2, 0  ;;  %v1537_v52 = vor.u32 %v1536_v28, %v1535_v37 }
 0x192   :  { %v1547_v63 = vsel %vm1541_vm9, %v1534_v48, 920167782  ;;  %v2248_v62 = vand.u32 31, %v2246_v55  ;;  %vm1540_vm11 = vcmp.lt.s32.totalorder %v3657_v38, 3  ;;  %v3744_v6 = vsel %vm1538_vm7, %v1522_v50, %v1525_v44 }
 0x193   :  { %v3746_v9 = vshrl.u32 %v1879_v21, 30  ;;  %v3750_v12 = vadd.f32 %v3400_v0, %v3481_v25  ;;  %3021 = vcosq.f32 %v3731_v5  ;;  %v1546_v30 = vsel %vm1538_vm7, %v1525_v44, %v1528_v23 }
 0x194   :  { %v2249_v3 = vsub.s32 32, %v2248_v62  ;;  %v3758_v47 = vsel %vm1540_vm11, %v1528_v23, %v1543_v11  ;;  %v1548_v50 = vsel %vm1540_vm11, %v1531_v56, %v1547_v63  ;;  %v1550_v49 = vsel %vm1538_vm7, %v1528_v23, %v1531_v56 }
 0x195   :  { %v1881_v0 = vshll.u32 %v3746_v9, 30  ;;  %v2242_v25 = vor.u32 8388608, %v2241_v27  ;;  %v1717_v44 = vand.u32 2139095040, %v3711_v54  ;;  %v2251_v35 = vshll.u32 %v4630_v1, %v2248_v62 }
 0x196   :  { %v2252_v28 = vshrl.u32 %v4627_v19, %v2249_v3  ;;  %v2255_v60 = vshrl.u32 %v4628_v58, %v2249_v3  ;;  %v2254_v2 = vshll.u32 %v4627_v19, %v2248_v62  ;;  %v2258_v37 = vshrl.u32 %v4624_v14, %v2249_v3 }
 0x197   :  { %v3768_v31 = vsub.s32 %v1878_v61, %v1881_v0  ;;  %v3775_v23 = vsel %vm1539_vm8, %v1546_v30, %v1548_v50  ;;  %v1551_v56 = vsel %vm1541_vm9, %v1537_v52, 1326507024  ;;  %v2247_v11 = vshrl.u32 %v2246_v55, 5 }
 0x198   :  { %v2257_v21 = vshll.u32 %v4628_v58, %v2248_v62  ;;  %v2253_v61 = vor.u32 %v2252_v28, %v2251_v35  ;;  %v2256_v27 = vor.u32 %v2255_v60, %v2254_v2  ;;  %v2260_v0 = vshll.u32 %v4624_v14, %v2248_v62 }
 0x199   :  { %v1884_v63 = vsub.s32 0, %v3768_v31  ;;  %v2261_v13 = vshrl.u32 %v4625_v57, %v2249_v3  ;;  %v2263_v10 = vshll.u32 %v4625_v57, %v2248_v62  ;;  %v2264_v30 = vshrl.u32 %v4626_v24, %v2249_v3 }
 0x19a   :  { %v2259_v45 = vor.u32 %v2258_v37, %v2257_v21  ;;  %v1552_v50 = vsel %vm1540_vm11, %v1534_v48, %v1551_v56  ;;  %v2282_v52 = vshll.u32 %v2242_v25, 8  ;;  %v1718_v39 = vshrl.u32 %v1717_v44, 23 }
 0x19b   :  { %v2629_v55 = vmin.u32 %v1884_v63, %v3768_v31  ;;  %v2250_v46 = vshrl.u32 %v4630_v1, %v2249_v3  ;;  %v2262_v28 = vor.u32 %v2261_v13, %v2260_v0  ;;  %v2265_v60 = vor.u32 %v2264_v30, %v2263_v10 }
 0x19c   :  { %vm2266_vm12 = vcmp.lt.s32.totalorder %v2247_v11, 1  ;;  %vm2267_vm13 = vcmp.lt.s32.totalorder %v2247_v11, 2  ;;  %vm2268_vm14 = vcmp.lt.s32.totalorder %v2247_v11, 3  ;;  %vm2269_vm15 = vcmp.lt.s32.totalorder %v2247_v11, 4 }
 0x19d   :  { %v1886_v35 = vclz %v2629_v55  ;;  %v3789_v2 = vpop.eup %3021  ;;  %v2271_v62 = vsel %vm2269_vm15, %v2259_v45, 2102212464  ;;  %v2274_v37 = vsel %vm2266_vm12, %v2253_v61, %v2256_v27  ;;  %v2275_v21 = vsel %vm2269_vm15, %v2262_v28, 920167782 }
 0x19e   :  { %v2278_v34 = vsel %vm2266_vm12, %v2256_v27, %v2259_v45  ;;  %v2270_v56 = vsel %vm2266_vm12, %v2250_v46, %v2253_v61  ;;  %v2276_v63 = vsel %vm2268_vm14, %v2259_v45, %v2275_v21  ;;  %v2279_v25 = vsel %vm2269_vm15, %v2265_v60, 1326507024 }
 0x19f   :  { %v2630_v48 = vadd.s32 4294967294, %v1886_v35  ;;  %v2272_v44 = vsel %vm2268_vm14, %v2256_v27, %v2271_v62  ;;  %v2277_v3 = vsel %vm2267_vm13, %v2274_v37, %v2276_v63  ;;  %v2280_v13 = vsel %vm2268_vm14, %v2262_v28, %v2279_v25 }
 0x1a0   :  { %v2624_v10 = vadd.s32 4294967169, %v1718_v39  ;;  %vm1501_vm0 = vcmp.eq.s32.totalorder %v3646_v15, 2  ;;  %v2281_v0 = vsel %vm2267_vm13, %v2278_v34, %v2280_v13  ;;  %vm1498_vm2 = vcmp.eq.s32.totalorder %v3646_v15, 0 }
 0x1a1   :  { %vm2631_vm1 = vcmp.lt.s32.totalorder %v2630_v48, 0  ;;  %v3794_v30 = vmul.u32.u64.low %v2282_v52, %v2277_v3  ;;  %v3795_v55 = vmul.u32.u64.high %v2282_v52, %v2277_v3, %v3794_v30  ;;  %v3803_v61 = vmul.f32 0.0003926991, %v3513_v7 }
 0x1a2   :  { %v1889_v35 = vsel %vm2631_vm1, 0, %v2630_v48  ;;  %v3799_v46 = vmul.u32.u64.low %v2282_v52, %v2281_v0  ;;  %v3800_v45 = vmul.u32.u64.high %v2282_v52, %v2281_v0, %v3799_v46  ;;  %v1499_v39 = vxor.u32 2147483648, %v3735_v22 }
 0x1a3   :  { %3023 = vsinq.f32 %v3731_v5  ;;  %v1894_v27 = vsub.s32 4294967266, %v1889_v35  ;;  %v2273_v34 = vsel %vm2267_vm13, %v2270_v56, %v2272_v44  ;;  %v1553_v28 = vsel %vm1539_vm8, %v1550_v49, %v1552_v50 }
 0x1a4   :  { %v3812_v60 = vmul.u32.u64.low %v3661_v16, %v3775_v23  ;;  %v3813_v62 = vmul.u32.u64.high %v3661_v16, %v3775_v23, %v3812_v60  ;;  %v1724_v37 = vadd.s32 1, %v2624_v10  ;;  %v1890_v21 = vsub.s32 32, %v1889_v35 }
 0x1a5   :  { %v1895_v7 = vadd.s32 127, %v1894_v27  ;;  %v2292_v48 = vadd.s32 1, %v3795_v55  ;;  %v4602_v63 = vand.u32 2147483647, %v3711_v54  ;;  %v2289_v5 = vmul.u32 %v2282_v52, %v2273_v34 }
 0x1a6   :  { %vm2291_vm3 = vc.u32 %v3800_v45, %v3794_v30  ;;  %vm1725_vm4 = vcmp.gt.s32.totalorder %v1724_v37, 0  ;;  %v1234_v49 = vmul.f32 0.15915494, %v3803_v61  ;;  %v1874_v23 = vadd.s32 %v3684_v40, %v3698_v26 }
 0x1a7   :  { %v3822_v11 = vmul.u32.u64.low %v3661_v16, %v1553_v28  ;;  %v3823_v50 = vmul.u32.u64.high %v3661_v16, %v1553_v28, %v3822_v11  ;;  %v2293_v56 = vsel %vm2291_vm3, %v2292_v48, %v3795_v55  ;;  %v3832_v52 = vsel %vm1539_vm8, %v3744_v6, %v3758_v47 }
 0x1a8   :  { %v1896_v25 = vshll.u32 %v1895_v7, 23  ;;  %v2294_v44 = vadd.s32 %v2293_v56, %v2289_v5  ;;  %v1726_v3 = vsel %vm1725_vm4, %v1724_v37, 0  ;;  %v1892_v10 = vshrl.u32 %v1874_v23, %v1890_v21 }
 0x1a9   :  { %v1721_v0 = vand.u32 8388607, %v4602_v63  ;;  %v1728_v46 = vand.u32 31, %v1726_v3  ;;  %v4631_v40 = vxor.u32 2147483648, %v3700_v59  ;;  %v1246_v6 = vfloor.f32 %v1234_v49 }
 0x1aa   :  { %v2295_v38 = vadd.s32 536870912, %v2294_v44  ;;  %v3846_v47 = vadd.f32 %v3509_v18, %v3396_v51  ;;  %v3851_v55 = vsel %vm1498_vm2, %v3700_v59, %v1499_v39  ;;  %v1891_v34 = vshll.u32 %v3768_v31, %v1889_v35 }
 0x1ab   :  { %v3842_v26 = vsel %vm1501_vm0, %v4631_v40, %v3735_v22  ;;  %v1729_v28 = vsub.s32 32, %v1728_v46  ;;  %v3858_v37 = vadd.s32 1, %v3813_v62  ;;  %v1897_v21 = vor.u32 4788187, %v1896_v25 }
 0x1ac   :  { %v3860_v7 = vshrl.u32 %v2295_v38, 30  ;;  %v1893_v18 = vor.u32 %v1892_v10, %v1891_v34  ;;  %v1722_v48 = vor.u32 8388608, %v1721_v0  ;;  %vm1282_vm5 = vcmp.lt.f32.partialorder %v3388_v42, 8000.0 }
 0x1ad   :  { %v3862_v51 = vpop.eup %3023  ;;  %v1732_v59 = vshrl.u32 %v4627_v19, %v1729_v28  ;;  %v1735_v39 = vshrl.u32 %v4628_v58, %v1729_v28  ;;  %v1738_v35 = vshrl.u32 %v4624_v14, %v1729_v28  ;;  %v1741_v5 = vshrl.u32 %v4625_v57, %v1729_v28 }
 0x1ae   :  { %v2297_v31 = vshll.u32 %v3860_v7, 30  ;;  %v1258_v49 = vmul.f32 6.2831855, %v1246_v6  ;;  %v1731_v11 = vshll.u32 %v4630_v1, %v1728_v46  ;;  %v1734_v23 = vshll.u32 %v4627_v19, %v1728_v46 }
 0x1af   :  { %v1740_v56 = vshll.u32 %v4624_v14, %v1728_v46  ;;  %v1744_v25 = vshrl.u32 %v4626_v24, %v1729_v28  ;;  %v1898_v10 = vand.u32 2147483647, %v1897_v21  ;;  %v1727_v40 = vshrl.u32 %v1726_v3, 5 }
 0x1b0   :  { %v3874_v0 = vsub.s32 %v2294_v44, %v2297_v31  ;;  %v1737_v38 = vshll.u32 %v4628_v58, %v1728_v46  ;;  %vm1397_vm6 = vcmp.eq.s32.totalorder %v3651_v41, 2  ;;  %v1733_v34 = vor.u32 %v1732_v59, %v1731_v11 }
 0x1b1   :  { %v1736_v63 = vor.u32 %v1735_v39, %v1734_v23  ;;  %v1742_v27 = vor.u32 %v1741_v5, %v1740_v56  ;;  %v1743_v6 = vshll.u32 %v4625_v57, %v1728_v46  ;;  %v1395_v13 = vxor.u32 2147483648, %v3862_v51 }
 0x1b2   :  { %vm1563_vm7 = vc.u32 %v3823_v50, %v3812_v60  ;;  %vm1820_vm8 = vcmp.lt.s32.totalorder %v3519_v17, 0  ;;  %v2300_v44 = vsub.s32 0, %v3874_v0  ;;  %v1739_v21 = vor.u32 %v1738_v35, %v1737_v38 }
 0x1b3   :  { %v1900_v3 = vcvt.s32.f32 %v1893_v18  ;;  %v1904_v31 = vsub.s32 4, %v3746_v9  ;;  %v1745_v22 = vor.u32 %v1744_v25, %v1743_v6  ;;  %v1270_v59 = vsub.f32 %v3803_v61, %v1258_v49 }
 0x1b4   :  { %v2645_v39 = vmin.u32 %v2300_v44, %v3874_v0  ;;  %vm1746_vm9 = vcmp.lt.s32.totalorder %v1727_v40, 1  ;;  %vm1749_vm10 = vcmp.lt.s32.totalorder %v1727_v40, 4  ;;  %v1762_v46 = vshll.u32 %v1722_v48, 8 }
 0x1b5   :  { %vm1394_vm11 = vcmp.eq.s32.totalorder %v3651_v41, 0  ;;  %v4632_v5 = vand.u32 2147483647, %v3519_v17  ;;  %v1901_v35 = vmul.f32 %v1900_v3, %v1898_v10  ;;  %v1730_v18 = vshrl.u32 %v4630_v1, %v1729_v28 }
 0x1b6   :  { %v1754_v23 = vsel %vm1746_vm9, %v1733_v34, %v1736_v63  ;;  %v1755_v56 = vsel %vm1749_vm10, %v1742_v27, 920167782  ;;  %v2302_v61 = vclz %v2645_v39  ;;  %vm1748_vm13 = vcmp.lt.s32.totalorder %v1727_v40, 3 }
 0x1b7   :  { %vm3890_vm12 = vcmp.le.f32.partialorder %v4632_v5, 0.7853982  ;;  %v1751_v49 = vsel %vm1749_vm10, %v1739_v21, 2102212464  ;;  %v1758_v25 = vsel %vm1746_vm9, %v1736_v63, %v1739_v21  ;;  %vm1747_vm14 = vcmp.lt.s32.totalorder %v1727_v40, 2 }
 0x1b8   :  { %v1756_v48 = vsel %vm1748_vm13, %v1739_v21, %v1755_v56  ;;  %v1759_v38 = vsel %vm1749_vm10, %v1745_v22, 1326507024  ;;  %v3899_v6 = vsel %vm1282_vm5, %v1270_v59, 0.0  ;;  %v2646_v44 = vadd.s32 4294967294, %v2302_v61 }
 0x1b9   :  { %v1750_v10 = vsel %vm1746_vm9, %v1730_v18, %v1733_v34  ;;  %v1757_v28 = vsel %vm1747_vm14, %v1754_v23, %v1756_v48  ;;  %v1760_v3 = vsel %vm1748_vm13, %v1742_v27, %v1759_v38  ;;  %vm1497_vm15 = vcmp.lt.s32.totalorder %v3646_v15, 2 }
 0x1ba   :  { %v1752_v39 = vsel %vm1748_vm13, %v1736_v63, %v1751_v49  ;;  %v1761_v5 = vsel %vm1747_vm14, %v1758_v25, %v1760_v3  ;;  %v3905_v54 = vmul.u32.u64.low %v1762_v46, %v1757_v28  ;;  %v3906_v43 = vmul.u32.u64.high %v1762_v46, %v1757_v28, %v3905_v54 }
 0x1bb   :  { %vm1393_vm0 = vcmp.lt.s32.totalorder %v3651_v41, 2  ;;  %v4635_v42 = vxor.u32 2147483648, %v3789_v2  ;;  %vm2647_vm1 = vcmp.lt.s32.totalorder %v2646_v44, 0  ;;  %v1905_v63 = vsel %vm1820_vm8, %v1904_v31, %v3746_v9 }
 0x1bc   :  { %v3915_v34 = vmul.u32.u64.low %v1762_v46, %v1761_v5  ;;  %v3916_v27 = vmul.u32.u64.high %v1762_v46, %v1761_v5, %v3915_v34  ;;  %v2290_v21 = vadd.s32 %v3794_v30, %v3800_v45  ;;  %v2305_v59 = vsel %vm2647_vm1, 0, %v2646_v44 }
 0x1bd   :  { %v1399_v22 = vsel %vm1397_vm6, %v4635_v42, %v3862_v51  ;;  %v2133_v18 = vand.u32 2139095040, %v3899_v6  ;;  %v1902_v23 = vxor.u32 2147483648, %v1901_v35  ;;  %v2306_v56 = vsub.s32 32, %v2305_v59 }
 0x1be   :  { %v2310_v61 = vsub.s32 4294967266, %v2305_v59  ;;  %v1753_v49 = vsel %vm1747_vm14, %v1750_v10, %v1752_v39  ;;  %v1565_v51 = vsel %vm1563_vm7, %v3858_v37, %v3813_v62  ;;  %v1772_v25 = vadd.s32 1, %v3906_v43 }
 0x1bf   :  { %v2134_v9 = vshrl.u32 %v2133_v18, 23  ;;  %v3932_v31 = vmul.f32 0.0003926991, %v3750_v12  ;;  %v1396_v30 = vsel %vm1394_vm11, %v3789_v2, %v1395_v13  ;;  %v1907_v45 = vsel %vm3890_vm12, 0, %v1905_v63 }
 0x1c0   :  { %v2308_v40 = vshrl.u32 %v2290_v21, %v2306_v56  ;;  %v2311_v48 = vadd.s32 127, %v2310_v61  ;;  %v2307_v38 = vshll.u32 %v3874_v0, %v2305_v59  ;;  %v1769_v44 = vmul.u32 %v1762_v46, %v1753_v49 }
 0x1c1   :  { %vm1771_vm2 = vc.u32 %v3916_v27, %v3905_v54  ;;  %v2640_v62 = vadd.s32 4294967169, %v2134_v9  ;;  %v1903_v12 = vsel %vm1820_vm8, %v1902_v23, %v1901_v35  ;;  %v2130_v2 = vand.u32 2147483647, %v3899_v6 }
 0x1c2   :  { %v2312_v37 = vshll.u32 %v2311_v48, 23  ;;  %v1773_v10 = vsel %vm1771_vm2, %v1772_v25, %v3906_v43  ;;  %v2309_v13 = vor.u32 %v2308_v40, %v2307_v38  ;;  %v1233_v39 = vmul.f32 0.15915494, %v3932_v31 }
 0x1c3   :  { %v1774_v28 = vadd.s32 %v1773_v10, %v1769_v44  ;;  %v2140_v3 = vadd.s32 1, %v2640_v62  ;;  %v3951_v0 = vsel %vm1497_vm15, %v3851_v55, %v3842_v26  ;;  %v4636_v46 = vshll.u32 %v3713_v29, 30 }
 0x1c4   :  { %v1911_v5 = vadd.s32 3, %v1907_v45  ;;  %v2313_v43 = vor.u32 4788187, %v2312_v37  ;;  %v3960_v42 = vsel %vm1393_vm0, %v1396_v30, %v1399_v22  ;;  %v4637_v34 = vmul.u32 %v3661_v16, %v3832_v52 }
 0x1c5   :  { %v3956_v35 = vsub.s32 %v3655_v8, %v4636_v46  ;;  %v1775_v21 = vadd.s32 536870912, %v1774_v28  ;;  %vm2141_vm3 = vcmp.gt.s32.totalorder %v2140_v3, 0  ;;  %v1906_v15 = vsel %vm3890_vm12, %v3519_v17, %v1903_v12 }
 0x1c6   :  { %v3965_v63 = vadd.s32 %v1565_v51, %v4637_v34  ;;  %v2314_v26 = vand.u32 2147483647, %v2313_v43  ;;  %v2137_v8 = vand.u32 8388607, %v2130_v2  ;;  %v2142_v55 = vsel %vm2141_vm3, %v2140_v3, 0 }
 0x1c7   :  { %v2316_v59 = vcvt.s32.f32 %v2309_v13  ;;  %v3972_v41 = vshrl.u32 %v1775_v21, 30  ;;  %v2144_v22 = vand.u32 31, %v2142_v55  ;;  %v1245_v18 = vfloor.f32 %v1233_v39 }
 0x1c8   :  { %v3974_v23 = vand.u32 3, %v1911_v5  ;;  %vm2236_vm4 = vcmp.lt.s32.totalorder %v3640_v33, 0  ;;  %v3979_v16 = vadd.f32 %v3402_v4, %v3588_v20  ;;  %v3983_v52 = vadd.f32 %v3693_v32, %v3398_v53 }
 0x1c9   :  { %3025 = vcosq.f32 %v1906_v15  ;;  %v2317_v11 = vmul.f32 %v2316_v59, %v2314_v26  ;;  %v1777_v56 = vshll.u32 %v3972_v41, 30  ;;  %v2145_v61 = vsub.s32 32, %v2144_v22 }
 0x1ca   :  { %3027 = vsinq.f32 %v1906_v15  ;;  %v2320_v49 = vsub.s32 4, %v3860_v7  ;;  %v2138_v51 = vor.u32 8388608, %v2137_v8  ;;  %v3988_v25 = vmul.f32 0.0003926991, %v3846_v47 }
 0x1cb   :  { %v1770_v4 = vadd.s32 %v3905_v54, %v3916_v27  ;;  %v3992_v20 = vsub.s32 %v1774_v28, %v1777_v56  ;;  %v2148_v53 = vshrl.u32 %v4627_v19, %v2145_v61  ;;  %v1257_v32 = vmul.f32 6.2831855, %v1245_v18 }
 0x1cc   :  { %v2143_v9 = vshrl.u32 %v2142_v55, 5  ;;  %v2147_v30 = vshll.u32 %v4630_v1, %v2144_v22  ;;  %v2151_v45 = vshrl.u32 %v4628_v58, %v2145_v61  ;;  %v2154_v40 = vshrl.u32 %v4624_v14, %v2145_v61 }
 0x1cd   :  { %v2318_v48 = vxor.u32 2147483648, %v2317_v11  ;;  %v1780_v38 = vsub.s32 0, %v3992_v20  ;;  %v2150_v47 = vshll.u32 %v4627_v19, %v2144_v22  ;;  %v2153_v44 = vshll.u32 %v4628_v58, %v2144_v22 }
 0x1ce   :  { %v4638_v54 = vand.u32 2147483647, %v3640_v33  ;;  %v2156_v62 = vshll.u32 %v4624_v14, %v2144_v22  ;;  %v2157_v12 = vshrl.u32 %v4625_v57, %v2145_v61  ;;  %v4009_v37 = vshll.u32 %v2138_v51, 8 }
 0x1cf   :  { %v1237_v10 = vmul.f32 0.15915494, %v3988_v25  ;;  %vm1281_vm6 = vcmp.lt.f32.partialorder %v3382_v36, 8000.0  ;;  %v2625_v13 = vmin.u32 %v1780_v38, %v3992_v20  ;;  %v2149_v28 = vor.u32 %v2148_v53, %v2147_v30 }
 0x1d0   :  { %vm4003_vm5 = vcmp.le.f32.partialorder %v4638_v54, 0.7853982  ;;  %v2152_v3 = vor.u32 %v2151_v45, %v2150_v47  ;;  %v2155_v39 = vor.u32 %v2154_v40, %v2153_v44  ;;  %v2158_v46 = vor.u32 %v2157_v12, %v2156_v62 }
 0x1d1   :  { %v2159_v5 = vshll.u32 %v4625_v57, %v2144_v22  ;;  %v2160_v43 = vshrl.u32 %v4626_v24, %v2145_v61  ;;  %v1269_v34 = vsub.f32 %v3932_v31, %v1257_v32  ;;  %v2319_v21 = vsel %vm2236_vm4, %v2318_v48, %v2317_v11 }
 0x1d2   :  { %v1782_v15 = vclz %v2625_v13  ;;  %v2146_v26 = vshrl.u32 %v4630_v1, %v2145_v61  ;;  %vm2162_vm7 = vcmp.lt.s32.totalorder %v2143_v9, 1  ;;  %vm2163_vm8 = vcmp.lt.s32.totalorder %v2143_v9, 2  ;;  %v4641_v13 = vld [vmem:[#allocation10_spill] sm:$0xff] }
 0x1d3   :  { %v2161_v8 = vor.u32 %v2160_v43, %v2159_v5  ;;  %vm2164_vm9 = vcmp.lt.s32.totalorder %v2143_v9, 3  ;;  %vm2165_vm10 = vcmp.lt.s32.totalorder %v2143_v9, 4  ;;  %v3026_v55 = vpop.eup %3025  ;;  %v2170_v56 = vsel %vm2162_vm7, %v2149_v28, %v2152_v3 }
 0x1d4   :  { %v2626_v59 = vadd.s32 4294967294, %v1782_v15  ;;  %v2167_v18 = vsel %vm2165_vm10, %v2155_v39, 2102212464  ;;  %v2171_v22 = vsel %vm2165_vm10, %v2158_v46, 920167782  ;;  %v3028_v51 = vpop.eup %3027  ;;  %v2166_v53 = vsel %vm2162_vm7, %v2146_v26, %v2149_v28  ;;  %v4642_v28 = vld [vmem:[#allocation18_spill] sm:$0xff] }
 0x1d5   :  { %v2172_v30 = vsel %vm2164_vm9, %v2155_v39, %v2171_v22  ;;  %v2174_v31 = vsel %vm2162_vm7, %v2152_v3, %v2155_v39  ;;  %v2175_v32 = vsel %vm2165_vm10, %v2161_v8, 1326507024  ;;  %v2168_v11 = vsel %vm2164_vm9, %v2152_v3, %v2167_v18 }
 0x1d6   :  { %vm2627_vm11 = vcmp.lt.s32.totalorder %v2626_v59, 0  ;;  %v2173_v45 = vsel %vm2163_vm8, %v2170_v56, %v2172_v30  ;;  %v2176_v61 = vsel %vm2164_vm9, %v2158_v46, %v2175_v32  ;;  %v2322_v44 = vsel %vm4003_vm5, %v3640_v33, %v2319_v21 }
 0x1d7   :  { %v1785_v40 = vsel %vm2627_vm11, 0, %v2626_v59  ;;  %v2177_v48 = vsel %vm2163_vm8, %v2174_v31, %v2176_v61  ;;  %v4023_v38 = vmul.u32.u64.low %v4009_v37, %v2173_v45  ;;  %v4024_v47 = vmul.u32.u64.high %v4009_v37, %v2173_v45, %v4023_v38 }
 0x1d8   :  { %v1786_v54 = vsub.s32 32, %v1785_v40  ;;  %v1790_v62 = vsub.s32 4294967266, %v1785_v40  ;;  %v1249_v12 = vfloor.f32 %v1237_v10  ;;  %vm1285_vm12 = vcmp.lt.f32.partialorder %v4641_v13, 8000.0 }
 0x1d9   :  { %vm1914_vm13 = vcmp.eq.s32.totalorder %v3974_v23, 0  ;;  %vm1716_vm14 = vcmp.lt.s32.totalorder %v4642_v28, 0  ;;  %v4034_v3 = vmul.u32.u64.low %v4009_v37, %v2177_v48  ;;  %v4035_v39 = vmul.u32.u64.high %v4009_v37, %v2177_v48, %v4034_v3 }
 0x1da   :  { %v4039_v46 = vsel %vm1281_vm6, %v1269_v34, 0.0  ;;  %v1787_v5 = vshll.u32 %v3992_v20, %v1785_v40  ;;  %v1788_v43 = vshrl.u32 %v1770_v4, %v1786_v54  ;;  %v1791_v21 = vadd.s32 127, %v1790_v62  ;;  %v4643_v20 = vld [vmem:[#allocation12_spill] sm:$0xff]  ;;  %v4644_v4 = vld [vmem:[#allocation13_spill] sm:$0xff] }
 0x1db   :  { %v2169_v10 = vsel %vm2163_vm8, %v2166_v53, %v2168_v11  ;;  %v2321_v15 = vsel %vm2236_vm4, %v2320_v49, %v3860_v7  ;;  %3029 = vcosq.f32 %v2322_v44  ;;  %v2188_v26 = vadd.s32 1, %v4024_v47 }
 0x1dc   :  { %v2029_v8 = vand.u32 2139095040, %v4039_v46  ;;  %v1918_v36 = vxor.u32 2147483648, %v3026_v55  ;;  %v1789_v34 = vor.u32 %v1788_v43, %v1787_v5  ;;  %v1792_v59 = vshll.u32 %v1791_v21, 23 }
 0x1dd   :  { %v1261_v18 = vmul.f32 6.2831855, %v1249_v12  ;;  %vm1494_vm15 = vweird.f32 %v4643_v20  ;;  %vm1390_vm0 = vweird.f32 %v4644_v4  ;;  %v1915_v9 = vxor.u32 2147483648, %v3028_v51 }
 0x1de   :  { %v2185_v56 = vmul.u32 %v4009_v37, %v2169_v10  ;;  %vm2187_vm1 = vc.u32 %v4035_v39, %v4023_v38  ;;  %v2030_v7 = vshrl.u32 %v2029_v8, 23  ;;  %vm1917_vm2 = vcmp.eq.s32.totalorder %v3974_v23, 2 }
 0x1df   :  { %v1793_v49 = vor.u32 4788187, %v1792_v59  ;;  %v1800_v22 = vsub.s32 4, %v3972_v41  ;;  %v2189_v53 = vsel %vm2187_vm1, %v2188_v26, %v4024_v47  ;;  %v2323_v30 = vsel %vm4003_vm5, 0, %v2321_v15 }
 0x1e0   :  { %3031 = vsinq.f32 %v2322_v44  ;;  %v2190_v31 = vadd.s32 %v2189_v53, %v2185_v56  ;;  %v2636_v32 = vadd.s32 4294967169, %v2030_v7  ;;  %v1919_v11 = vsel %vm1917_vm2, %v1918_v36, %v3028_v51 }
 0x1e1   :  { %v1794_v45 = vand.u32 2147483647, %v1793_v49  ;;  %v1796_v37 = vcvt.s32.f32 %v1789_v34  ;;  %v1273_v61 = vsub.f32 %v3988_v25, %v1261_v18  ;;  %v1916_v40 = vsel %vm1914_vm13, %v3026_v55, %v1915_v9 }
 0x1e2   :  { %v2191_v48 = vadd.s32 536870912, %v2190_v31  ;;  %v2026_v54 = vand.u32 2147483647, %v4039_v46  ;;  %v2036_v62 = vadd.s32 1, %v2636_v32  ;;  %v1567_v47 = vadd.s32 536870912, %v3965_v63 }
 0x1e3   :  { %v1797_v12 = vmul.f32 %v1796_v37, %v1794_v45  ;;  %v1801_v27 = vsel %vm1716_vm14, %v1800_v22, %v3972_v41  ;;  %v4070_v51 = vsel %vm1285_vm12, %v1273_v61, 0.0  ;;  %vm1913_vm3 = vcmp.lt.s32.totalorder %v3974_v23, 2 }
 0x1e4   :  { %v2327_v25 = vadd.s32 3, %v2323_v30  ;;  %v4073_v44 = vshrl.u32 %v2191_v48, 30  ;;  %vm2037_vm4 = vcmp.gt.s32.totalorder %v2036_v62, 0  ;;  %v1920_v55 = vsel %vm1913_vm3, %v1916_v40, %v1919_v11 }
 0x1e5   :  { %v4645_v3 = vand.u32 2147483647, %v4642_v28  ;;  %v1798_v43 = vxor.u32 2147483648, %v1797_v12  ;;  %v2038_v21 = vsel %vm2037_vm4, %v2036_v62, 0  ;;  %v4081_v41 = vpop.eup %3029  ;;  %v2033_v10 = vand.u32 8388607, %v2026_v54 }
 0x1e6   :  { %v2193_v23 = vshll.u32 %v4073_v44, 30  ;;  %v2040_v15 = vand.u32 31, %v2038_v21  ;;  %v4091_v26 = vsel %vm1494_vm15, nan, %v3951_v0  ;;  %v4096_v8 = vsel %vm1390_vm0, nan, %v3960_v42 }
 0x1e7   :  { %vm4077_vm5 = vcmp.le.f32.partialorder %v4645_v3, 0.7853982  ;;  %v1676_v36 = vsub.s32 0, %v3956_v35  ;;  %vm1910_vm6 = vweird.f32 %v3519_v17  ;;  %v4100_v34 = vshrl.u32 %v1567_v47, 30 }
 0x1e8   :  { %v1803_v13 = vsel %vm4077_vm5, 0, %v1801_v27  ;;  %v4102_v59 = vand.u32 3, %v2327_v25  ;;  %v4104_v18 = vsub.s32 %v2190_v31, %v2193_v23  ;;  %v4106_v9 = vsub.s32 32, %v2040_v15 }
 0x1e9   :  { %v4108_v20 = vsel %vm1910_vm6, nan, %v1920_v55  ;;  %v2334_v0 = vxor.u32 2147483648, %v4081_v41  ;;  %v1799_v42 = vsel %vm1716_vm14, %v1798_v43, %v1797_v12  ;;  %v4113_v4 = vadd.s32 3, %v1803_v13 }
 0x1ea   :  { %v3032_v56 = vpop.eup %3031  ;;  %v2196_v17 = vsub.s32 0, %v4104_v18  ;;  %v2034_v7 = vor.u32 8388608, %v2033_v10  ;;  %v4116_v49 = vshrl.u32 %v2038_v21, 5  ;;  %v2043_v22 = vshll.u32 %v4630_v1, %v2040_v15 }
 0x1eb   :  { %v2044_v53 = vshrl.u32 %v4627_v19, %v4106_v9  ;;  %v2046_v30 = vshll.u32 %v4627_v19, %v2040_v15  ;;  %v2047_v31 = vshrl.u32 %v4628_v58, %v4106_v9  ;;  %v2050_v32 = vshrl.u32 %v4624_v14, %v4106_v9 }
 0x1ec   :  { %vm2333_vm7 = vcmp.eq.s32.totalorder %v4102_v59, 2  ;;  %v1802_v11 = vsel %vm4077_vm5, %v4642_v28, %v1799_v42  ;;  %v2641_v45 = vmin.u32 %v2196_v17, %v4104_v18  ;;  %v2049_v37 = vshll.u32 %v4628_v58, %v2040_v15 }
 0x1ed   :  { %v2053_v61 = vshrl.u32 %v4625_v57, %v4106_v9  ;;  %v2331_v40 = vxor.u32 2147483648, %v3032_v56  ;;  %v4134_v48 = vor.u32 %v2044_v53, %v2043_v22  ;;  %v4136_v62 = vor.u32 %v2047_v31, %v2046_v30 }
 0x1ee   :  { %v2052_v47 = vshll.u32 %v4624_v14, %v2040_v15  ;;  %vm2330_vm8 = vcmp.eq.s32.totalorder %v4102_v59, 0  ;;  %vm2132_vm9 = vcmp.lt.s32.totalorder %v3899_v6, 0  ;;  %v2198_v12 = vclz %v2641_v45 }
 0x1ef   :  { %v2051_v27 = vor.u32 %v2050_v32, %v2049_v37  ;;  %v4141_v25 = vshll.u32 %v2034_v7, 8  ;;  %v2445_v55 = vand.u32 2139095040, %v4070_v51  ;;  %3033 = vcosq.f32 %v1802_v11 }
 0x1f0   :  { %v2054_v3 = vor.u32 %v2053_v61, %v2052_v47  ;;  %v2055_v5 = vshll.u32 %v4625_v57, %v2040_v15  ;;  %v2056_v43 = vshrl.u32 %v4626_v24, %v4106_v9  ;;  %3035 = vsinq.f32 %v1802_v11 }
 0x1f1   :  { %v2642_v21 = vadd.s32 4294967294, %v2198_v12  ;;  %vm2058_vm10 = vcmp.lt.s32.totalorder %v4116_v49, 1  ;;  %vm2061_vm11 = vcmp.lt.s32.totalorder %v4116_v49, 4  ;;  %vm2329_vm12 = vcmp.lt.s32.totalorder %v4102_v59, 2 }
 0x1f2   :  { %v2057_v13 = vor.u32 %v2056_v43, %v2055_v5  ;;  %vm2060_vm13 = vcmp.lt.s32.totalorder %v4116_v49, 3  ;;  %v2066_v23 = vsel %vm2058_vm10, %v4134_v48, %v4136_v62  ;;  %v2067_v10 = vsel %vm2061_vm11, %v2054_v3, 920167782 }
 0x1f3   :  { %vm2643_vm14 = vcmp.lt.s32.totalorder %v2642_v21, 0  ;;  %v2216_v15 = vsub.s32 4, %v4073_v44  ;;  %vm2059_vm15 = vcmp.lt.s32.totalorder %v4116_v49, 2  ;;  %v2068_v42 = vsel %vm2060_vm13, %v2051_v27, %v2067_v10 }
 0x1f4   :  { %v2201_v17 = vsel %vm2643_vm14, 0, %v2642_v21  ;;  %v2069_v7 = vsel %vm2059_vm15, %v2066_v23, %v2068_v42  ;;  %v2070_v22 = vsel %vm2058_vm10, %v4136_v62, %v2051_v27  ;;  %v2071_v53 = vsel %vm2061_vm11, %v2057_v13, 1326507024 }
 0x1f5   :  { %v2186_v30 = vadd.s32 %v4023_v38, %v4035_v39  ;;  %v2202_v31 = vsub.s32 32, %v2201_v17  ;;  %v2206_v32 = vsub.s32 4294967266, %v2201_v17  ;;  %v2446_v11 = vshrl.u32 %v2445_v55, 23 }
 0x1f6   :  { %v2335_v45 = vsel %vm2333_vm7, %v2334_v0, %v3032_v56  ;;  %v2072_v37 = vsel %vm2060_vm13, %v2054_v3, %v2071_v53  ;;  %v4175_v61 = vmul.u32.u64.low %v4141_v25, %v2069_v7  ;;  %v4176_v47 = vmul.u32.u64.high %v4141_v25, %v2069_v7, %v4175_v61 }
 0x1f7   :  { %vm2326_vm0 = vweird.f32 %v3640_v33  ;;  %v2203_v12 = vshll.u32 %v4104_v18, %v2201_v17  ;;  %v2204_v5 = vshrl.u32 %v2186_v30, %v2202_v31  ;;  %v2207_v38 = vadd.s32 127, %v2206_v32 }
 0x1f8   :  { %v2073_v39 = vsel %vm2059_vm15, %v2070_v22, %v2072_v37  ;;  %v2332_v0 = vsel %vm2330_vm8, %v4081_v41, %v2331_v40  ;;  %v2217_v56 = vsel %vm2132_vm9, %v2216_v15, %v4073_v44  ;;  %v2063_v18 = vsel %vm2061_vm11, %v2051_v27, 2102212464 }
 0x1f9   :  { %v4190_v55 = vmul.u32.u64.low %v4141_v25, %v2073_v39  ;;  %v4191_v3 = vmul.u32.u64.high %v4141_v25, %v2073_v39, %v4190_v55  ;;  %v2205_v43 = vor.u32 %v2204_v5, %v2203_v12  ;;  %v2208_v21 = vshll.u32 %v2207_v38, 23  ;;  %v3034_v23 = vpop.eup %3033 }
 0x1fa   :  { %v2652_v13 = vadd.s32 4294967169, %v2446_v11  ;;  %v4197_v10 = vadd.f32 %v4108_v20, %v4091_v26  ;;  %vm4201_vm1 = vcmp.le.f32.partialorder %v2130_v2, 0.7853982  ;;  %v2042_v44 = vshrl.u32 %v4630_v1, %v4106_v9  ;;  %v3036_v15 = vpop.eup %3035 }
 0x1fb   :  { %v4208_v40 = vmul.f32 0.0003926991, %v3979_v16  ;;  %v2336_v27 = vsel %vm2329_vm12, %v2332_v0, %v2335_v45  ;;  %v1808_v42 = vand.u32 3, %v4113_v4  ;;  %v2209_v26 = vor.u32 4788187, %v2208_v21 }
 0x1fc   :  { %v2452_v20 = vadd.s32 1, %v2652_v13  ;;  %v2219_v2 = vsel %vm4201_vm1, 0, %v2217_v56  ;;  %v2062_v17 = vsel %vm2058_vm10, %v2042_v44, %v4134_v48  ;;  %v2064_v16 = vsel %vm2060_vm13, %v4136_v62, %v2063_v18 }
 0x1fd   :  { %v2442_v9 = vand.u32 2147483647, %v4070_v51  ;;  %v1814_v7 = vxor.u32 2147483648, %v3034_v23  ;;  %v2210_v59 = vand.u32 2147483647, %v2209_v26  ;;  %v2212_v22 = vcvt.s32.f32 %v2205_v43 }
 0x1fe   :  { %vm2453_vm2 = vcmp.gt.s32.totalorder %v2452_v20, 0  ;;  %v1811_v4 = vxor.u32 2147483648, %v3036_v15  ;;  %v2084_v53 = vadd.s32 1, %v4176_v47  ;;  %v1232_v31 = vmul.f32 0.15915494, %v4208_v40 }
 0x1ff   :  { %v2454_v30 = vsel %vm2453_vm2, %v2452_v20, 0  ;;  %vm1809_vm3 = vcmp.lt.s32.totalorder %v1808_v42, 2  ;;  %vm1810_vm4 = vcmp.eq.s32.totalorder %v1808_v42, 0  ;;  %v2213_v32 = vmul.f32 %v2212_v22, %v2210_v59 }
 0x200   :  { %vm2083_vm5 = vc.u32 %v4191_v3, %v4175_v61  ;;  %v2456_v48 = vand.u32 31, %v2454_v30  ;;  %v4228_v62 = vsel %vm2326_vm0, nan, %v2336_v27  ;;  %vm1813_vm6 = vcmp.eq.s32.totalorder %v1808_v42, 2  ;;  %v4650_v27 = vld [vmem:[#allocation9_spill] sm:$0xff] }
 0x201   :  { %v2449_v11 = vand.u32 8388607, %v2442_v9  ;;  %v4233_v45 = vmul.f32 0.0003926991, %v3983_v52  ;;  %v2214_v37 = vxor.u32 2147483648, %v2213_v32  ;;  %v2223_v12 = vadd.s32 3, %v2219_v2 }
 0x202   :  { %v2065_v5 = vsel %vm2059_vm15, %v2062_v17, %v2064_v16  ;;  %v2457_v38 = vsub.s32 32, %v2456_v48  ;;  %v1812_v39 = vsel %vm1810_vm4, %v3034_v23, %v1811_v4  ;;  %v1815_v0 = vsel %vm1813_vm6, %v1814_v7, %v3036_v15 }
 0x203   :  { %v2085_v56 = vsel %vm2083_vm5, %v2084_v53, %v4176_v47  ;;  %v1244_v33 = vfloor.f32 %v1232_v31  ;;  %vm1806_vm7 = vweird.f32 %v4642_v28  ;;  %v2215_v55 = vsel %vm2132_vm9, %v2214_v37, %v2213_v32 }
 0x204   :  { %v2455_v43 = vshrl.u32 %v2454_v30, 5  ;;  %v2460_v52 = vshrl.u32 %v4627_v19, %v2457_v38  ;;  %v2463_v21 = vshrl.u32 %v4628_v58, %v2457_v38  ;;  %v2218_v49 = vsel %vm4201_vm1, %v3899_v6, %v2215_v55 }
 0x205   :  { %v2459_v18 = vshll.u32 %v4630_v1, %v2456_v48  ;;  %v2462_v13 = vshll.u32 %v4627_v19, %v2456_v48  ;;  %v2466_v47 = vshrl.u32 %v4624_v14, %v2457_v38  ;;  %3037 = vcosq.f32 %v2218_v49 }
 0x206   :  { %v2465_v23 = vshll.u32 %v4628_v58, %v2456_v48  ;;  %v2468_v44 = vshll.u32 %v4624_v14, %v2456_v48  ;;  %v2469_v15 = vshrl.u32 %v4625_v57, %v2457_v38  ;;  %vm1280_vm8 = vcmp.lt.f32.partialorder %v4650_v27, 8000.0 }
 0x207   :  { %3039 = vsinq.f32 %v2218_v49  ;;  %v2081_v26 = vmul.u32 %v4141_v25, %v2065_v5  ;;  %v2461_v41 = vor.u32 %v2460_v52, %v2459_v18  ;;  %v2464_v20 = vor.u32 %v2463_v21, %v2462_v13 }
 0x208   :  { %v2467_v2 = vor.u32 %v2466_v47, %v2465_v23  ;;  %v2470_v17 = vor.u32 %v2469_v15, %v2468_v44  ;;  %v2471_v16 = vshll.u32 %v4625_v57, %v2456_v48  ;;  %v2472_v7 = vshrl.u32 %v4626_v24, %v2457_v38 }
 0x209   :  { %v1816_v59 = vsel %vm1809_vm3, %v1812_v39, %v1815_v0  ;;  %v2224_v22 = vand.u32 3, %v2223_v12  ;;  %v4257_v4 = vadd.s32 %v2085_v56, %v2081_v26  ;;  %v2450_v53 = vor.u32 8388608, %v2449_v11 }
 0x20a   :  { %v2473_v30 = vor.u32 %v2472_v7, %v2471_v16  ;;  %vm2474_vm9 = vcmp.lt.s32.totalorder %v2455_v43, 1  ;;  %vm2477_vm10 = vcmp.lt.s32.totalorder %v2455_v43, 4  ;;  %v1256_v31 = vmul.f32 6.2831855, %v1244_v33 }
 0x20b   :  { %v2458_v25 = vshrl.u32 %v4630_v1, %v2457_v38  ;;  %vm2476_vm11 = vcmp.lt.s32.totalorder %v2455_v43, 3  ;;  %v2482_v32 = vsel %vm2474_vm9, %v2461_v41, %v2464_v20  ;;  %v2483_v37 = vsel %vm2477_vm10, %v2470_v17, 920167782 }
 0x20c   :  { %v2479_v5 = vsel %vm2477_vm10, %v2467_v2, 2102212464  ;;  %v2484_v55 = vsel %vm2476_vm11, %v2467_v2, %v2483_v37  ;;  %v2486_v48 = vsel %vm2474_vm9, %v2464_v20, %v2467_v2  ;;  %v2487_v52 = vsel %vm2477_vm10, %v2473_v30, 1326507024 }
 0x20d   :  { %v1817_v42 = vsel %vm1806_vm7, nan, %v1816_v59  ;;  %v2087_v12 = vadd.s32 536870912, %v4257_v4  ;;  %vm2475_vm12 = vcmp.lt.s32.totalorder %v2455_v43, 2  ;;  %v2490_v11 = vshll.u32 %v2450_v53, 8 }
 0x20e   :  { %v2478_v39 = vsel %vm2474_vm9, %v2458_v25, %v2461_v41  ;;  %v2485_v0 = vsel %vm2475_vm12, %v2482_v32, %v2484_v55  ;;  %v2488_v56 = vsel %vm2476_vm11, %v2470_v17, %v2487_v52  ;;  %v1268_v38 = vsub.f32 %v4208_v40, %v1256_v31  ;;  %v4651_v52 = vld [vmem:[#allocation5_spill] sm:$0xff] }
 0x20f   :  { %v2480_v33 = vsel %vm2476_vm11, %v2464_v20, %v2479_v5  ;;  %v2489_v21 = vsel %vm2475_vm12, %v2486_v48, %v2488_v56  ;;  %v4266_v49 = vmul.u32.u64.low %v2490_v11, %v2485_v0  ;;  %v4267_v18 = vmul.u32.u64.high %v2490_v11, %v2485_v0, %v4266_v49  ;;  %v3038_v13 = vpop.eup %3037 }
 0x210   :  { %v4270_v28 = vmul.u32.u64.low %v2490_v11, %v2489_v21  ;;  %v4271_v47 = vmul.u32.u64.high %v2490_v11, %v2489_v21, %v4270_v28  ;;  %v4275_v23 = vsel %vm1280_vm8, %v1268_v38, 0.0  ;;  %v1236_v44 = vmul.f32 0.15915494, %v4233_v45  ;;  %v4653_v38 = vld [vmem:[#allocation11_spill] sm:$0xff] }
 0x211   :  { %v3040_v15 = vpop.eup %3039  ;;  %v1569_v40 = vshll.u32 %v4100_v34, 30  ;;  %v2551_v26 = vadd.f32 %v4197_v10, %v4228_v62  ;;  %vm2229_vm13 = vcmp.eq.s32.totalorder %v2224_v22, 2  ;;  %v2230_v41 = vxor.u32 2147483648, %v3038_v13 }
 0x212   :  { %v2227_v20 = vxor.u32 2147483648, %v3040_v15  ;;  %v4281_v2 = vshrl.u32 %v2087_v12, 30  ;;  %v2481_v17 = vsel %vm2475_vm12, %v2478_v39, %v2480_v33  ;;  %v1925_v16 = vand.u32 2139095040, %v4275_v23 }
 0x213   :  { %v2546_v27 = vadd.f32 %v1817_v42, %v4096_v8  ;;  %vm2225_vm14 = vcmp.lt.s32.totalorder %v2224_v22, 2  ;;  %vm2226_vm15 = vcmp.eq.s32.totalorder %v2224_v22, 0  ;;  %v2231_v7 = vsel %vm2229_vm13, %v2230_v41, %v3040_v15 }
 0x214   :  { %v2228_v59 = vsel %vm2226_vm15, %v3038_v13, %v2227_v20  ;;  %vm2499_vm0 = vc.u32 %v4271_v47, %v4266_v49  ;;  %v2500_v10 = vadd.s32 1, %v4267_v18  ;;  %v1248_v62 = vfloor.f32 %v1236_v44 }
 0x215   :  { %v2621_v53 = vmin.u32 %v1676_v36, %v3956_v35  ;;  %vm2222_vm1 = vweird.f32 %v3899_v6  ;;  %v2232_v43 = vsel %vm2225_vm14, %v2228_v59, %v2231_v7  ;;  %v2497_v30 = vmul.u32 %v2490_v11, %v2481_v17  ;;  %v4652_v6 = vld [vmem:[#allocation6_spill] sm:$0xff] }
 0x216   :  { %v2233_v31 = vsel %vm2222_vm1, nan, %v2232_v43  ;;  %v2089_v8 = vshll.u32 %v4281_v2, 30  ;;  %v2501_v22 = vsel %vm2499_vm0, %v2500_v10, %v4267_v18  ;;  %v1926_v25 = vshrl.u32 %v1925_v16, 23 }
 0x217   :  { %v2550_v32 = vadd.f32 %v2546_v27, %v2233_v31  ;;  %v2502_v37 = vadd.s32 %v2501_v22, %v2497_v30  ;;  %v4296_v5 = vsub.s32 %v3965_v63, %v1569_v40  ;;  %v1260_v48 = vmul.f32 6.2831855, %v1248_v62 }
 0x218   :  { %v2632_v55 = vadd.s32 4294967169, %v1926_v25  ;;  %v2555_v42 = vmul.f32 %v4651_v52, %v2551_v26  ;;  %v1678_v36 = vclz %v2621_v53  ;;  %v4301_v11 = vsub.s32 %v4257_v4, %v2089_v8  ;;  %v4654_v52 = vld [vmem:[#allocation17_spill] sm:$0xff] }
 0x219   :  { %v2503_v12 = vadd.s32 536870912, %v2502_v37  ;;  %v2554_v39 = vmul.f32 %v2550_v32, %v4652_v6  ;;  %v1272_v56 = vsub.f32 %v4233_v45, %v1260_v48  ;;  %vm1284_vm2 = vcmp.lt.f32.partialorder %v4653_v38, 8000.0 }
 0x21a   :  { %v1932_v0 = vadd.s32 1, %v2632_v55  ;;  %v1572_v21 = vsub.s32 0, %v4296_v5  ;;  %v2622_v13 = vadd.s32 4294967294, %v1678_v36  ;;  %v2092_v4 = vsub.s32 0, %v4301_v11 }
 0x21b   :  { %v4305_v33 = vshrl.u32 %v2503_v12, 30  ;;  %v4307_v63 = vadd.f32 %v2555_v42, %v2554_v39  ;;  %v4310_v18 = vsel %vm1284_vm2, %v1272_v56, 0.0  ;;  %v1922_v45 = vand.u32 2147483647, %v4275_v23  ;;  %v4655_v42 = vld [vmem:[#allocation16_spill] sm:$0xff] }
 0x21c   :  { %vm1933_vm3 = vcmp.gt.s32.totalorder %v1932_v0, 0  ;;  %v2617_v40 = vmin.u32 %v1572_v21, %v4296_v5  ;;  %vm2623_vm4 = vcmp.lt.s32.totalorder %v2622_v13, 0  ;;  %v2637_v20 = vmin.u32 %v2092_v4, %v4301_v11 }
 0x21d   :  { %v2505_v28 = vshll.u32 %v4305_v33, 30  ;;  %v1934_v44 = vsel %vm1933_vm3, %v1932_v0, 0  ;;  %v1929_v27 = vand.u32 8388607, %v1922_v45  ;;  %v1681_v62 = vsel %vm2623_vm4, 0, %v2622_v13 }
 0x21e   :  { %v1936_v15 = vand.u32 31, %v1934_v44  ;;  %v1574_v53 = vclz %v2617_v40  ;;  %v1935_v43 = vshrl.u32 %v1934_v44, 5  ;;  %v1666_v36 = vadd.s32 %v4655_v42, %v4654_v52 }
 0x21f   :  { %v4316_v41 = vsub.s32 %v2502_v37, %v2505_v28  ;;  %v2094_v12 = vclz %v2637_v20  ;;  %v1930_v6 = vor.u32 8388608, %v1929_v27  ;;  %v1682_v39 = vsub.s32 32, %v1681_v62 }
 0x220   :  { %v1937_v26 = vsub.s32 32, %v1936_v15  ;;  %v1939_v7 = vshll.u32 %v4630_v1, %v1936_v15  ;;  %v1942_v59 = vshll.u32 %v4627_v19, %v1936_v15  ;;  %v1945_v30 = vshll.u32 %v4628_v58, %v1936_v15 }
 0x221   :  { %v2508_v31 = vsub.s32 0, %v4316_v41  ;;  %v1948_v25 = vshll.u32 %v4624_v14, %v1936_v15  ;;  %v1951_v55 = vshll.u32 %v4625_v57, %v1936_v15  ;;  %v2618_v0 = vadd.s32 4294967294, %v1574_v53 }
 0x222   :  { %v1940_v17 = vshrl.u32 %v4627_v19, %v1937_v26  ;;  %v1943_v16 = vshrl.u32 %v4628_v58, %v1937_v26  ;;  %v1946_v10 = vshrl.u32 %v4624_v14, %v1937_v26  ;;  %v1949_v37 = vshrl.u32 %v4625_v57, %v1937_v26 }
 0x223   :  { %v1952_v48 = vshrl.u32 %v4626_v24, %v1937_v26  ;;  %v2653_v21 = vmin.u32 %v2508_v31, %v4316_v41  ;;  %vm1954_vm5 = vcmp.lt.s32.totalorder %v1935_v43, 1  ;;  %vm1957_vm6 = vcmp.lt.s32.totalorder %v1935_v43, 4 }
 0x224   :  { %v1941_v8 = vor.u32 %v1940_v17, %v1939_v7  ;;  %v1944_v22 = vor.u32 %v1943_v16, %v1942_v59  ;;  %v1947_v32 = vor.u32 %v1946_v10, %v1945_v30  ;;  %v1950_v56 = vor.u32 %v1949_v37, %v1948_v25 }
 0x225   :  { %v1953_v38 = vor.u32 %v1952_v48, %v1951_v55  ;;  %v2341_v13 = vand.u32 2139095040, %v4310_v18  ;;  %v1686_v40 = vsub.s32 4294967266, %v1681_v62  ;;  %v2638_v17 = vadd.s32 4294967294, %v2094_v12 }
 0x226   :  { %v1962_v28 = vsel %vm1954_vm5, %v1941_v8, %v1944_v22  ;;  %v1963_v44 = vsel %vm1957_vm6, %v1950_v56, 920167782  ;;  %v1966_v4 = vsel %vm1954_vm5, %v1944_v22, %v1947_v32  ;;  %vm1956_vm7 = vcmp.lt.s32.totalorder %v1935_v43, 3 }
 0x227   :  { %v1967_v15 = vsel %vm1957_vm6, %v1953_v38, 1326507024  ;;  %v1970_v20 = vshll.u32 %v1930_v6, 8  ;;  %vm1955_vm8 = vcmp.lt.s32.totalorder %v1935_v43, 2  ;;  %v1959_v16 = vsel %vm1957_vm6, %v1947_v32, 2102212464 }
 0x228   :  { %v1964_v27 = vsel %vm1956_vm7, %v1947_v32, %v1963_v44  ;;  %v1968_v7 = vsel %vm1956_vm7, %v1950_v56, %v1967_v15  ;;  %v2510_v59 = vclz %v2653_v21  ;;  %v1938_v10 = vshrl.u32 %v4630_v1, %v1937_v26 }
 0x229   :  { %v1965_v53 = vsel %vm1955_vm8, %v1962_v28, %v1964_v27  ;;  %v1969_v30 = vsel %vm1955_vm8, %v1966_v4, %v1968_v7  ;;  %vm2619_vm9 = vcmp.lt.s32.totalorder %v2618_v0, 0  ;;  %v2342_v37 = vshrl.u32 %v2341_v13, 23 }
 0x22a   :  { %v4343_v31 = vmul.u32.u64.low %v1970_v20, %v1969_v30  ;;  %v4344_v25 = vmul.u32.u64.high %v1970_v20, %v1969_v30, %v4343_v31  ;;  %v1684_v55 = vshrl.u32 %v1666_v36, %v1682_v39  ;;  %v1687_v48 = vadd.s32 127, %v1686_v40 }
 0x22b   :  { %v1958_v52 = vsel %vm1954_vm5, %v1938_v10, %v1941_v8  ;;  %v1960_v32 = vsel %vm1956_vm7, %v1944_v22, %v1959_v16  ;;  %v4348_v42 = vmul.u32.u64.low %v1970_v20, %v1965_v53  ;;  %v4349_v12 = vmul.u32.u64.high %v1970_v20, %v1965_v53, %v4348_v42 }
 0x22c   :  { %v2648_v26 = vadd.s32 4294967169, %v2342_v37  ;;  %v1683_v6 = vshll.u32 %v3956_v35, %v1681_v62  ;;  %v4353_v56 = vsel %vm2619_vm9, 0, %v2618_v0  ;;  %vm2639_vm10 = vcmp.lt.s32.totalorder %v2638_v17, 0 }
 0x22d   :  { %v2654_v38 = vadd.s32 4294967294, %v2510_v59  ;;  %v1961_v21 = vsel %vm1955_vm8, %v1958_v52, %v1960_v32  ;;  %v1688_v39 = vshll.u32 %v1687_v48, 23  ;;  %vm1979_vm11 = vc.u32 %v4344_v25, %v4348_v42 }
 0x22e   :  { %v2348_v13 = vadd.s32 1, %v2648_v26  ;;  %v4356_v36 = vor.u32 %v1684_v55, %v1683_v6  ;;  %v1582_v8 = vsub.s32 4294967266, %v4353_v56  ;;  %v4361_v22 = vsel %vm2639_vm10, 0, %v2638_v17 }
 0x22f   :  { %v1980_v28 = vadd.s32 1, %v4349_v12  ;;  %vm2655_vm13 = vcmp.lt.s32.totalorder %v2654_v38, 0  ;;  %v1977_v35 = vmul.u32 %v1970_v20, %v1961_v21  ;;  %v2338_v62 = vand.u32 2147483647, %v4310_v18 }
 0x230   :  { %vm2349_vm12 = vcmp.gt.s32.totalorder %v2348_v13, 0  ;;  %v4366_v4 = vor.u32 4788187, %v1688_v39  ;;  %v1692_v15 = vcvt.s32.f32 %v4356_v36  ;;  %v1562_v40 = vadd.s32 %v3812_v60, %v3823_v50 }
 0x231   :  { %v2350_v43 = vsel %vm2349_vm12, %v2348_v13, 0  ;;  %v1981_v0 = vsel %vm1979_vm11, %v1980_v28, %v4349_v12  ;;  %v1583_v16 = vadd.s32 127, %v1582_v8  ;;  %v2102_v27 = vsub.s32 4294967266, %v4361_v22 }
 0x232   :  { %v2352_v44 = vand.u32 31, %v2350_v43  ;;  %v1982_v17 = vadd.s32 %v1981_v0, %v1977_v35  ;;  %v4372_v7 = vsel %vm2655_vm13, 0, %v2654_v38  ;;  %v2345_v10 = vand.u32 8388607, %v2338_v62 }
 0x233   :  { %v2351_v53 = vshrl.u32 %v2350_v43, 5  ;;  %v1584_v8 = vshll.u32 %v1583_v16, 23  ;;  %v2098_v28 = vsub.s32 32, %v4361_v22  ;;  %vm2028_vm7 = vcmp.lt.s32.totalorder %v4039_v46, 0 }
 0x234   :  { %v2353_v20 = vsub.s32 32, %v2352_v44  ;;  %v1983_v59 = vadd.s32 536870912, %v1982_v17  ;;  %v2355_v30 = vshll.u32 %v4630_v1, %v2352_v44  ;;  %v2358_v37 = vshll.u32 %v4627_v19, %v2352_v44 }
 0x235   :  { %v2361_v50 = vshll.u32 %v4628_v58, %v2352_v44  ;;  %v2364_v52 = vshll.u32 %v4624_v14, %v2352_v44  ;;  %v2367_v6 = vshll.u32 %v4625_v57, %v2352_v44  ;;  %v2346_v21 = vor.u32 8388608, %v2345_v10 }
 0x236   :  { %v2356_v31 = vshrl.u32 %v4627_v19, %v2353_v20  ;;  %v2359_v60 = vshrl.u32 %v4628_v58, %v2353_v20  ;;  %v4381_v55 = vshrl.u32 %v1983_v59, 30  ;;  %v2362_v48 = vshrl.u32 %v4624_v14, %v2353_v20 }
 0x237   :  { %v2365_v32 = vshrl.u32 %v4625_v57, %v2353_v20  ;;  %v2368_v38 = vshrl.u32 %v4626_v24, %v2353_v20  ;;  %v1578_v58 = vsub.s32 32, %v4353_v56  ;;  %v2103_v14 = vadd.s32 127, %v2102_v27 }
 0x238   :  { %v2357_v12 = vor.u32 %v2356_v31, %v2355_v30  ;;  %v2360_v26 = vor.u32 %v2359_v60, %v2358_v37  ;;  %v1985_v19 = vshll.u32 %v4381_v55, 30  ;;  %v2363_v13 = vor.u32 %v2362_v48, %v2361_v50 }
 0x239   :  { %v2366_v39 = vor.u32 %v2365_v32, %v2364_v52  ;;  %v2369_v35 = vor.u32 %v2368_v38, %v2367_v6  ;;  %vm2370_vm14 = vcmp.lt.s32.totalorder %v2351_v53, 1  ;;  %vm2373_vm15 = vcmp.lt.s32.totalorder %v2351_v53, 4 }
 0x23a   :  { %v4391_v43 = vsub.s32 %v1982_v17, %v1985_v19  ;;  %v2518_v57 = vsub.s32 4294967266, %v4372_v7  ;;  %vm2372_vm0 = vcmp.lt.s32.totalorder %v2351_v53, 3  ;;  %v2378_v24 = vsel %vm2370_vm14, %v2357_v12, %v2360_v26 }
 0x23b   :  { %v2379_v0 = vsel %vm2373_vm15, %v2366_v39, 920167782  ;;  %vm2371_vm1 = vcmp.lt.s32.totalorder %v2351_v53, 2  ;;  %v2386_v16 = vshll.u32 %v2346_v21, 8  ;;  %v2375_v10 = vsel %vm2373_vm15, %v2363_v13, 2102212464 }
 0x23c   :  { %v1988_v44 = vsub.s32 0, %v4391_v43  ;;  %v2380_v59 = vsel %vm2372_vm0, %v2363_v13, %v2379_v0  ;;  %v2382_v17 = vsel %vm2370_vm14, %v2360_v26, %v2363_v13  ;;  %v2383_v27 = vsel %vm2373_vm15, %v2369_v35, 1326507024 }
 0x23d   :  { %v2381_v30 = vsel %vm2371_vm1, %v2378_v24, %v2380_v59  ;;  %v2082_v31 = vadd.s32 %v4175_v61, %v4191_v3  ;;  %v2354_v60 = vshrl.u32 %v4630_v1, %v2353_v20  ;;  %v2384_v50 = vsel %vm2372_vm0, %v2366_v39, %v2383_v27 }
 0x23e   :  { %v2633_v37 = vmin.u32 %v1988_v44, %v4391_v43  ;;  %v2104_v48 = vshll.u32 %v2103_v14, 23  ;;  %v2385_v52 = vsel %vm2371_vm1, %v2382_v17, %v2384_v50  ;;  %v1580_v38 = vshrl.u32 %v1562_v40, %v1578_v58 }
 0x23f   :  { %v4405_v32 = vmul.u32.u64.low %v2386_v16, %v2381_v30  ;;  %v4406_v6 = vmul.u32.u64.high %v2386_v16, %v2381_v30, %v4405_v32  ;;  %v2374_v21 = vsel %vm2370_vm14, %v2354_v60, %v2357_v12  ;;  %v2376_v13 = vsel %vm2372_vm0, %v2360_v26, %v2375_v10 }
 0x240   :  { %v1990_v19 = vclz %v2633_v37  ;;  %v2100_v61 = vshrl.u32 %v2082_v31, %v2098_v28  ;;  %v2519_v3 = vadd.s32 127, %v2518_v57  ;;  %v1579_v1 = vshll.u32 %v4296_v5, %v4353_v56 }
 0x241   :  { %v4411_v35 = vmul.u32.u64.low %v2386_v16, %v2385_v52  ;;  %v4412_v24 = vmul.u32.u64.high %v2386_v16, %v2385_v52, %v4411_v35  ;;  %v1585_v20 = vor.u32 4788187, %v1584_v8  ;;  %v2099_v39 = vshll.u32 %v4301_v11, %v4361_v22 }
 0x242   :  { %v2634_v14 = vadd.s32 4294967294, %v1990_v19  ;;  %v2105_v0 = vor.u32 4788187, %v2104_v48  ;;  %v2514_v40 = vsub.s32 32, %v4372_v7  ;;  %v2377_v12 = vsel %vm2371_vm1, %v2374_v21, %v2376_v13 }
 0x243   :  { %v2396_v26 = vadd.s32 1, %v4406_v6  ;;  %v1690_v58 = vand.u32 2147483647, %v4366_v4  ;;  %v1581_v28 = vor.u32 %v1580_v38, %v1579_v1  ;;  %v2498_v57 = vadd.s32 %v4266_v49, %v4271_v47 }
 0x244   :  { %vm2635_vm2 = vcmp.lt.s32.totalorder %v2634_v14, 0  ;;  %v2101_v5 = vor.u32 %v2100_v61, %v2099_v39  ;;  %v2520_v56 = vshll.u32 %v2519_v3, 23  ;;  %vm2395_vm3 = vc.u32 %v4412_v24, %v4405_v32  ;;  %v4656_v3 = vld [vmem:[#allocation14_spill] sm:$0xff] }
 0x245   :  { %v1993_v8 = vsel %vm2635_vm2, 0, %v2634_v14  ;;  %v1978_v11 = vadd.s32 %v4348_v42, %v4344_v25  ;;  %v2393_v44 = vmul.u32 %v2386_v16, %v2377_v12  ;;  %v1586_v59 = vand.u32 2147483647, %v1585_v20 }
 0x246   :  { %v1994_v22 = vsub.s32 32, %v1993_v8  ;;  %v1998_v53 = vsub.s32 4294967266, %v1993_v8  ;;  %v2106_v10 = vand.u32 2147483647, %v2105_v0  ;;  %v2516_v4 = vshrl.u32 %v2498_v57, %v2514_v40  ;;  %v4657_v40 = vld [vmem:[#allocation15_spill] sm:$0xff] }
 0x247   :  { %v2397_v30 = vsel %vm2395_vm3, %v2396_v26, %v4406_v6  ;;  %v1995_v49 = vshll.u32 %v4391_v43, %v1993_v8  ;;  %v1693_v31 = vmul.f32 %v1692_v15, %v1690_v58  ;;  %v1588_v37 = vcvt.s32.f32 %v1581_v28 }
 0x248   :  { %v1996_v47 = vshrl.u32 %v1978_v11, %v1994_v22  ;;  %v1999_v17 = vadd.s32 127, %v1998_v53  ;;  %v2398_v27 = vadd.s32 %v2397_v30, %v2393_v44  ;;  %v2108_v60 = vcvt.s32.f32 %v2101_v5 }
 0x249   :  { %v2515_v25 = vshll.u32 %v4316_v41, %v4372_v7  ;;  %v2521_v42 = vor.u32 4788187, %v2520_v56  ;;  %v1589_v52 = vmul.f32 %v1588_v37, %v1586_v59  ;;  %v1694_v21 = vxor.u32 2147483648, %v1693_v31 }
 0x24a   :  { %v1997_v16 = vor.u32 %v1996_v47, %v1995_v49  ;;  %v2000_v50 = vshll.u32 %v1999_v17, 23  ;;  %v2399_v48 = vadd.s32 536870912, %v2398_v27  ;;  %v2109_v38 = vmul.f32 %v2108_v60, %v2106_v10 }
 0x24b   :  { %v2517_v6 = vor.u32 %v2516_v4, %v2515_v25  ;;  %v2522_v13 = vand.u32 2147483647, %v2521_v42  ;;  %vm1612_vm4 = vcmp.lt.s32.totalorder %v4656_v3, 0  ;;  %v1590_v35 = vxor.u32 2147483648, %v1589_v52 }
 0x24c   :  { %v2001_v19 = vor.u32 4788187, %v2000_v50  ;;  %v4434_v43 = vshrl.u32 %v2399_v48, 30  ;;  %v2004_v36 = vcvt.s32.f32 %v1997_v16  ;;  %v2110_v41 = vxor.u32 2147483648, %v2109_v38 }
 0x24d   :  { %v2524_v7 = vcvt.s32.f32 %v2517_v6  ;;  %v1695_v39 = vsel %vm1612_vm4, %v1694_v21, %v1693_v31  ;;  %v1696_v14 = vsub.s32 4, %v3713_v29  ;;  %v1592_v0 = vsub.s32 4, %v4100_v34 }
 0x24e   :  { %v2002_v61 = vand.u32 2147483647, %v2001_v19  ;;  %v2401_v15 = vshll.u32 %v4434_v43, 30  ;;  %vm1508_vm5 = vcmp.lt.s32.totalorder %v4657_v40, 0  ;;  %v4658_v58 = vand.u32 2147483647, %v4656_v3 }
 0x24f   :  { %v2525_v12 = vmul.f32 %v2524_v7, %v2522_v13  ;;  %v1591_v57 = vsel %vm1508_vm5, %v1590_v35, %v1589_v52  ;;  %v2111_v56 = vsel %vm2028_vm7, %v2110_v41, %v2109_v38  ;;  %v1697_v22 = vsel %vm1612_vm4, %v1696_v14, %v3713_v29 }
 0x250   :  { %v2005_v1 = vmul.f32 %v2004_v36, %v2002_v61  ;;  %v2402_v20 = vsub.s32 %v2398_v27, %v2401_v15  ;;  %vm4445_vm6 = vcmp.le.f32.partialorder %v4658_v58, 0.7853982  ;;  %v4661_v53 = vand.u32 2147483647, %v4657_v40 }
 0x251   :  { %v1698_v5 = vsel %vm4445_vm6, %v4656_v3, %v1695_v39  ;;  %v1593_v59 = vsel %vm1508_vm5, %v1592_v0, %v4100_v34  ;;  %vm4470_vm9 = vcmp.le.f32.partialorder %v2026_v54, 0.7853982  ;;  %v2526_v30 = vxor.u32 2147483648, %v2525_v12 }
 0x252   :  { %v2404_v26 = vsub.s32 0, %v2402_v20  ;;  %v2006_v8 = vxor.u32 2147483648, %v2005_v1  ;;  %vm4460_vm8 = vcmp.le.f32.partialorder %v4661_v53, 0.7853982  ;;  %3041 = vcosq.f32 %v1698_v5 }
 0x253   :  { %v1594_v10 = vsel %vm4460_vm8, %v4657_v40, %v1591_v57  ;;  %v2114_v49 = vsel %vm4470_vm9, %v4039_v46, %v2111_v56  ;;  %vm1924_vm10 = vcmp.lt.s32.totalorder %v4275_v23, 0  ;;  %3043 = vsinq.f32 %v1698_v5 }
 0x254   :  { %v2649_v11 = vmin.u32 %v2404_v26, %v2402_v20  ;;  %v2112_v34 = vsub.s32 4, %v4281_v2  ;;  %v2007_v47 = vsel %vm1924_vm10, %v2006_v8, %v2005_v1  ;;  %v1699_v54 = vsel %vm4445_vm6, 0, %v1697_v22 }
 0x255   :  { %v1595_v27 = vsel %vm4460_vm8, 0, %v1593_v59  ;;  %3045 = vcosq.f32 %v1594_v10  ;;  %vm2444_vm11 = vcmp.lt.s32.totalorder %v4070_v51, 0  ;;  %vm4490_vm12 = vcmp.le.f32.partialorder %v1922_v45, 0.7853982 }
 0x256   :  { %v2406_v29 = vclz %v2649_v11  ;;  %3047 = vcosq.f32 %v2114_v49  ;;  %v2527_v31 = vsel %vm2444_vm11, %v2526_v30, %v2525_v12  ;;  %vm4496_vm14 = vcmp.le.f32.partialorder %v2442_v9, 0.7853982 }
 0x257   :  { %3049 = vsinq.f32 %v2114_v49  ;;  %v2010_v25 = vsel %vm4490_vm12, %v4275_v23, %v2007_v47  ;;  %v2113_v45 = vsel %vm2028_vm7, %v2112_v34, %v4281_v2  ;;  %v2394_v16 = vadd.s32 %v4405_v32, %v4412_v24 }
 0x258   :  { %v2650_v17 = vadd.s32 4294967294, %v2406_v29  ;;  %v1703_v52 = vadd.s32 3, %v1699_v54  ;;  %3051 = vsinq.f32 %v1594_v10  ;;  %v2530_v9 = vsel %vm4496_vm14, %v4070_v51, %v2527_v31 }
 0x259   :  { %v2008_v38 = vsub.s32 4, %v4381_v55  ;;  %3053 = vcosq.f32 %v2010_v25  ;;  %v1599_v13 = vadd.s32 3, %v1595_v27  ;;  %v2115_v2 = vsel %vm4470_vm9, 0, %v2113_v45 }
 0x25a   :  { %vm2651_vm13 = vcmp.lt.s32.totalorder %v2650_v17, 0  ;;  %v2528_v32 = vsub.s32 4, %v4305_v33  ;;  %3055 = vsinq.f32 %v2010_v25  ;;  %v1704_v41 = vand.u32 3, %v1703_v52 }
 0x25b   :  { %v2409_v42 = vsel %vm2651_vm13, 0, %v2650_v17  ;;  %3057 = vcosq.f32 %v2530_v9  ;;  %v2009_v15 = vsel %vm1924_vm10, %v2008_v38, %v4381_v55  ;;  %v2119_v7 = vadd.s32 3, %v2115_v2 }
 0x25c   :  { %v2410_v50 = vsub.s32 32, %v2409_v42  ;;  %v2414_v48 = vsub.s32 4294967266, %v2409_v42  ;;  %v2411_v6 = vshll.u32 %v2402_v20, %v2409_v42  ;;  %v3042_v36 = vpop.eup %3041  ;;  %3059 = vsinq.f32 %v2530_v9 }
 0x25d   :  { %v3044_v35 = vpop.eup %3043  ;;  %v4518_v39 = vand.u32 3, %v1599_v13  ;;  %v2529_v14 = vsel %vm2444_vm11, %v2528_v32, %v4305_v33  ;;  %v1710_v12 = vxor.u32 2147483648, %v3042_v36  ;;  %v2011_v26 = vsel %vm4490_vm12, 0, %v2009_v15 }
 0x25e   :  { %v2412_v19 = vshrl.u32 %v2394_v16, %v2410_v50  ;;  %v2415_v21 = vadd.s32 127, %v2414_v48  ;;  %v1707_v55 = vxor.u32 2147483648, %v3044_v35  ;;  %vm1705_vm15 = vcmp.lt.s32.totalorder %v1704_v41, 2 }
 0x25f   :  { %v3046_v20 = vpop.eup %3045  ;;  %v2120_v5 = vand.u32 3, %v2119_v7  ;;  %v2531_v56 = vsel %vm4496_vm14, 0, %v2529_v14  ;;  %v2424_v11 = vsub.s32 4, %v4434_v43  ;;  %vm1706_vm0 = vcmp.eq.s32.totalorder %v1704_v41, 0 }
 0x260   :  { %v2413_v24 = vor.u32 %v2412_v19, %v2411_v6  ;;  %v2416_v61 = vshll.u32 %v2415_v21, 23  ;;  %v3048_v0 = vpop.eup %3047  ;;  %vm1709_vm1 = vcmp.eq.s32.totalorder %v1704_v41, 2  ;;  %v2015_v53 = vadd.s32 3, %v2011_v26 }
 0x261   :  { %v3050_v57 = vpop.eup %3049  ;;  %v2126_v33 = vxor.u32 2147483648, %v3048_v0  ;;  %v1711_v59 = vsel %vm1709_vm1, %v1710_v12, %v3044_v35  ;;  %vm1602_vm2 = vcmp.eq.s32.totalorder %v4518_v39, 0  ;;  %v1708_v29 = vsel %vm1706_vm0, %v3042_v36, %v1707_v55 }
 0x262   :  { %v2417_v1 = vor.u32 4788187, %v2416_v61  ;;  %v2420_v28 = vcvt.s32.f32 %v2413_v24  ;;  %v3052_v22 = vpop.eup %3051  ;;  %v2123_v10 = vxor.u32 2147483648, %v3050_v57  ;;  %v1606_v49 = vxor.u32 2147483648, %v3046_v20 }
 0x263   :  { %v3054_v44 = vpop.eup %3053  ;;  %v2535_v34 = vadd.s32 3, %v2531_v56  ;;  %vm2340_vm3 = vcmp.lt.s32.totalorder %v4310_v18, 0  ;;  %vm2125_vm4 = vcmp.eq.s32.totalorder %v2120_v5, 2  ;;  %vm4532_vm5 = vcmp.le.f32.partialorder %v2338_v62, 0.7853982  ;;  %v4672_v56 = vld [vmem:[#allocation7_spill] sm:$0xff] }
 0x264   :  { %v2418_v58 = vand.u32 2147483647, %v2417_v1  ;;  %v3056_v30 = vpop.eup %3055  ;;  %v2425_v27 = vsel %vm2340_vm3, %v2424_v11, %v4434_v43  ;;  %vm2122_vm6 = vcmp.eq.s32.totalorder %v2120_v5, 0  ;;  %v2127_v37 = vsel %vm2125_vm4, %v2126_v33, %v3050_v57  ;;  %v4673_v11 = vld [vmem:[#allocation8_spill] sm:$0xff] }
 0x265   :  { %v3058_v47 = vpop.eup %3057  ;;  %v2016_v60 = vand.u32 3, %v2015_v53  ;;  %v2124_v42 = vsel %vm2122_vm6, %v3048_v0, %v2123_v10  ;;  %v2019_v45 = vxor.u32 2147483648, %v3056_v30  ;;  %v2022_v16 = vxor.u32 2147483648, %v3054_v44 }
 0x266   :  { %v2421_v8 = vmul.f32 %v2420_v28, %v2418_v58  ;;  %v3060_v31 = vpop.eup %3059  ;;  %v1603_v50 = vxor.u32 2147483648, %v3052_v22  ;;  %v2536_v62 = vand.u32 3, %v2535_v34  ;;  %v2427_v48 = vsel %vm4532_vm5, 0, %v2425_v27 }
 0x267   :  { %vm1605_vm7 = vcmp.eq.s32.totalorder %v4518_v39, 2  ;;  %vm2121_vm8 = vcmp.lt.s32.totalorder %v2120_v5, 2  ;;  %v2539_v43 = vxor.u32 2147483648, %v3060_v31  ;;  %v2542_v52 = vxor.u32 2147483648, %v3058_v47 }
 0x268   :  { %v2422_v4 = vxor.u32 2147483648, %v2421_v8  ;;  %v1712_v9 = vsel %vm1705_vm15, %v1708_v29, %v1711_v59  ;;  %v2128_v38 = vsel %vm2121_vm8, %v2124_v42, %v2127_v37  ;;  %vm2018_vm9 = vcmp.eq.s32.totalorder %v2016_v60, 0 }
 0x269   :  { %vm2021_vm10 = vcmp.eq.s32.totalorder %v2016_v60, 2  ;;  %v1607_v6 = vsel %vm1605_vm7, %v1606_v49, %v3052_v22  ;;  %v2020_v19 = vsel %vm2018_vm9, %v3054_v44, %v2019_v45  ;;  %v2431_v13 = vadd.s32 3, %v2427_v48 }
 0x26a   :  { %v2423_v54 = vsel %vm2340_vm3, %v2422_v4, %v2421_v8  ;;  %v2023_v21 = vsel %vm2021_vm10, %v2022_v16, %v3056_v30  ;;  %v1604_v2 = vsel %vm1602_vm2, %v3046_v20, %v1603_v50  ;;  %vm2118_vm11 = vweird.f32 %v4039_v46 }
 0x26b   :  { %v2426_v25 = vsel %vm4532_vm5, %v4310_v18, %v2423_v54  ;;  %vm2538_vm12 = vcmp.eq.s32.totalorder %v2536_v62, 0  ;;  %vm2541_vm13 = vcmp.eq.s32.totalorder %v2536_v62, 2  ;;  %v2129_v32 = vsel %vm2118_vm11, nan, %v2128_v38 }
 0x26c   :  { %3061 = vcosq.f32 %v2426_v25  ;;  %v2540_v24 = vsel %vm2538_vm12, %v3058_v47, %v2539_v43  ;;  %v2543_v61 = vsel %vm2541_vm13, %v2542_v52, %v3060_v31  ;;  %vm2017_vm14 = vcmp.lt.s32.totalorder %v2016_v60, 2 }
 0x26d   :  { %3063 = vsinq.f32 %v2426_v25  ;;  %vm1702_vm15 = vweird.f32 %v4656_v3  ;;  %vm1601_vm0 = vcmp.lt.s32.totalorder %v4518_v39, 2  ;;  %v2024_v36 = vsel %vm2017_vm14, %v2020_v19, %v2023_v21 }
 0x26e   :  { %v1713_v15 = vsel %vm1702_vm15, nan, %v1712_v9  ;;  %v1608_v35 = vsel %vm1601_vm0, %v1604_v2, %v1607_v6  ;;  %vm2537_vm1 = vcmp.lt.s32.totalorder %v2536_v62, 2  ;;  %v2432_v41 = vand.u32 3, %v2431_v13 }
 0x26f   :  { %v2549_v7 = vadd.f32 %v2129_v32, %v1713_v15  ;;  %v2544_v1 = vsel %vm2537_vm1, %v2540_v24, %v2543_v61  ;;  %vm2014_vm2 = vweird.f32 %v4275_v23  ;;  %vm1598_vm3 = vweird.f32 %v4657_v40 }
 0x270   :  { %v2025_v20 = vsel %vm2014_vm2, nan, %v2024_v36  ;;  %v1609_v0 = vsel %vm1598_vm3, nan, %v1608_v35  ;;  %vm2534_vm4 = vweird.f32 %v4070_v51  ;;  %vm2437_vm5 = vcmp.eq.s32.totalorder %v2432_v41, 2 }
 0x271   :  { %v2545_v12 = vsel %vm2534_vm4, nan, %v2544_v1  ;;  %v2559_v26 = vrot.slane %v4307_v63, 4  ;;  %v2548_v28 = vadd.f32 %v2025_v20, %v1609_v0  ;;  %vm2434_vm6 = vcmp.eq.s32.totalorder %v2432_v41, 0 }
 0x272   :  { %v2553_v58 = vadd.f32 %v2549_v7, %v2545_v12  ;;  %vm2433_vm7 = vcmp.lt.s32.totalorder %v2432_v41, 2  ;;  %vm2430_vm8 = vweird.f32 %v4310_v18  ;;  %vm2574_vm9 = vcmask 1041409  }
 0x273   :  { %v2560_v51 = vadd.f32 %v2559_v26, %v4307_v63 }
 0x274   :  { %v2557_v8 = vmul.f32 %v4672_v56, %v2553_v58 }
 0x275   :  { %v2561_v33 = vrot.slane %v2560_v51, 2 }
 0x276   :  { %v3062_v46 = vpop.eup %3061 }
 0x277   :  { %v3064_v14 = vpop.eup %3063  ;;  %v2438_v3 = vxor.u32 2147483648, %v3062_v46  ;;  %v2562_v59 = vadd.f32 %v2561_v33, %v2560_v51 }
 0x278   :  { %v2435_v39 = vxor.u32 2147483648, %v3064_v14 }
 0x279   :  { %v2439_v57 = vsel %vm2437_vm5, %v2438_v3, %v3064_v14  ;;  %v2563_v30 = vrot.slane %v2562_v59, 1 }
 0x27a   :  { %v2436_v23 = vsel %vm2434_vm6, %v3062_v46, %v2435_v39 }
 0x27b   :  { %v2440_v40 = vsel %vm2433_vm7, %v2436_v23, %v2439_v57  ;;  %v2564_v18 = vadd.f32 %v2563_v30, %v2562_v59 }
 0x27c   :  { %v2441_v55 = vsel %vm2430_vm8, nan, %v2440_v40 }
 0x27d   :  { %v2552_v5 = vadd.f32 %v2548_v28, %v2441_v55 }
 0x27f   :  { %v2556_v22 = vmul.f32 %v2552_v5, %v4673_v11 }
 0x281   :  { %v2565_v53 = vadd.f32 %v2557_v8, %v2556_v22 }
 0x283   :  { %v2566_v44 = vrot.slane %v2565_v53, 4 }
 0x285   :  { %v2567_v10 = vadd.f32 %v2566_v44, %v2565_v53 }
 0x287   :  { %v2568_v4 = vrot.slane %v2567_v10, 2 }
 0x289   :  { %v2569_v29 = vadd.f32 %v2568_v4, %v2567_v10 }
 0x28b   :  { %v2570_v49 = vrot.slane %v2569_v29, 1 }
 0x28d   :  { %v2571_v34 = vadd.f32 %v2570_v49, %v2569_v29 }
 0x28f   :  { %v2575_v47 = vsel %vm2574_vm9, %v2571_v34, %v2564_v18 }
 0x290   :  { %2577 = vst [vmem:[#allocation2] sm:$0x3] %v2575_v47 }
 0x291   :  { %3076 = shalt.err (!%p3073_p4)
}
 0x292   :  { %s3077_s25 = scalar_lea.hbm %s4573_s4, 32 }
 0x293   :  { %p3078_p5 = scmp.ne.s32.totalorder %s4573_s4, %s3077_s25  ;;  %p3081_p6 = scmp.lt.u32.totalorder %s3077_s25, %s4573_s4 }
 0x295   :  { %p3083_p7 = pnand %p3081_p6, %p3078_p5 }
 0x297   :  { %3086 = shalt.err (!%p3083_p7)
}
 0x298   :  { %2587 = dma.vmem_to_hbm [thread:$0]  %s2585_s22, 32, %s4573_s4, [#allocation3]  }
 0x299   :  { %3087 = dma.done.wait [#allocation3], 32  }
 0x29a   :  { %3088 = vsyncadd [#allocation3], 4294967264 }
 0x29b   :  { %2591 = vsyncpa [#allocation3], 1 }

</bundles_post_ra>
